<compile_context>
chip_gen: v7x
topology: tpu7x:2x2x1
jax: 0.10.0
libtpu: 0.0.40
codegen_flags: <defaults>
</compile_context>

<pallas_src>
import jax
import jax.numpy as jnp
from jax import lax
from jax.experimental import pallas as pl
from jax.experimental.pallas import tpu as pltpu


def _detector_kernel(x_ref, w1_ref, scale_ref, shift_ref, w2_ref, b2_ref,
                     mask_ref, out_ref):
    # x_ref:     (1, H*W, 9*C)  bf16  im2col patches for one batch element
    # w1_ref:    (9*C, C)       bf16  3x3 conv weights, taps stacked along K
    # scale_ref: (1, C)         f32   folded BN scale
    # shift_ref: (1, C)         f32   folded conv-bias + BN shift
    # w2_ref:    (C, Dp)        bf16  1x1 conv weights, N padded to 128 lanes
    # b2_ref:    (1, Dp)        f32   1x1 conv bias (padded)
    # mask_ref:  (1, Dp)        f32   1.0 where sigmoid applies, else 0.0
    # out_ref:   (1, H*W, Dp)   f32   lane-dense output
    y = jnp.dot(x_ref[0], w1_ref[...], preferred_element_type=jnp.float32)
    # conv bias + BatchNorm (inference) folded into per-channel affine
    y = y * scale_ref[...] + shift_ref[...]
    # LeakyReLU(0.1)
    y = jnp.where(y > 0, y, 0.1 * y)
    # 1x1 conv
    z = jnp.dot(y.astype(jnp.bfloat16), w2_ref[...],
                preferred_element_type=jnp.float32) + b2_ref[...]
    # sigmoid on box attributes 4.. (precomputed channel mask)
    z = jnp.where(mask_ref[...] > 0.5, jax.nn.sigmoid(z), z)
    out_ref[0] = z.astype(out_ref.dtype)


def yolo_detector_pallas(x_nchw, params, num_box, num_class):
    w1_oihw, b1, gamma, beta, run_mean, run_var, w2_oihw, b2 = params
    B, C, H, W = x_nchw.shape
    num_attr = 5 + num_class
    D = num_box * num_attr
    Dp = 128                      # pad output channels to a full lane tile
    K9 = 9 * C
    M = H * W
    eps = 1e-5

    # --- glue: layout + parameter folding (plain JAX) ---
    x_nhwc = jnp.transpose(x_nchw, (0, 2, 3, 1)).astype(jnp.float32)
    x_pad = jnp.pad(x_nhwc, ((0, 0), (1, 1), (1, 1), (0, 0)))
    # im2col: tap (dy,dx) contributes channels [(dy*3+dx)*C : (dy*3+dx+1)*C]
    taps = [x_pad[:, dy:dy + H, dx:dx + W, :]
            for dy in range(3) for dx in range(3)]
    x_col = jnp.concatenate(taps, axis=-1).reshape(B, M, K9).astype(jnp.bfloat16)

    # 3x3 conv weights: OIHW -> (dy,dx,ci,co) -> (9*C, C), matching x_col order
    w1_col = jnp.transpose(w1_oihw, (2, 3, 1, 0)).reshape(K9, C).astype(jnp.bfloat16)

    # conv-bias + BatchNorm (eval mode) folded into per-channel scale/shift
    scale = (gamma / jnp.sqrt(run_var + eps)).astype(jnp.float32)
    shift = (beta + (b1 - run_mean) * scale).astype(jnp.float32)
    scale = scale.reshape(1, C)
    shift = shift.reshape(1, C)

    # 1x1 conv: (D, C, 1, 1) -> (C, D), zero-pad N to Dp=128 lanes
    w2 = jnp.transpose(w2_oihw[:, :, 0, 0], (1, 0)).astype(jnp.float32)
    w2 = jnp.pad(w2, ((0, 0), (0, Dp - D))).astype(jnp.bfloat16)
    b2p = jnp.pad(b2.astype(jnp.float32), (0, Dp - D)).reshape(1, Dp)

    # sigmoid applies to attributes 4.. of each box (real channels only)
    ch = jnp.arange(Dp)
    sig_mask = ((ch < D) & ((ch % num_attr) >= 4)).astype(jnp.float32).reshape(1, Dp)

    out = pl.pallas_call(
        _detector_kernel,
        out_shape=jax.ShapeDtypeStruct((B, M, Dp), jnp.float32),
        grid_spec=pltpu.PrefetchScalarGridSpec(
            num_scalar_prefetch=0,
            grid=(B,),
            in_specs=[
                pl.BlockSpec((1, M, K9), lambda b: (b, 0, 0)),
                pl.BlockSpec((K9, C), lambda b: (0, 0)),
                pl.BlockSpec((1, C), lambda b: (0, 0)),
                pl.BlockSpec((1, C), lambda b: (0, 0)),
                pl.BlockSpec((C, Dp), lambda b: (0, 0)),
                pl.BlockSpec((1, Dp), lambda b: (0, 0)),
                pl.BlockSpec((1, Dp), lambda b: (0, 0)),
            ],
            out_specs=pl.BlockSpec((1, M, Dp), lambda b: (b, 0, 0)),
        ),
        compiler_params=pltpu.CompilerParams(
            dimension_semantics=("parallel",)),
    )(x_col, w1_col, scale, shift, w2, b2p, sig_mask)

    # drop channel padding, restore (B, H, W, num_box, 5+num_class)
    return out[..., :D].reshape(B, H, W, num_box, num_attr)


def yolo_detector_reference(x_nchw, params, num_box, num_class):
    """Pure-JAX f32 reference mirroring the PyTorch forward (BN in eval mode)."""
    w1_oihw, b1, gamma, beta, run_mean, run_var, w2_oihw, b2 = params
    B, C, H, W = x_nchw.shape
    num_attr = 5 + num_class
    eps = 1e-5

    y = lax.conv_general_dilated(
        x_nchw.astype(jnp.float32), w1_oihw.astype(jnp.float32),
        window_strides=(1, 1), padding="SAME",
        dimension_numbers=("NCHW", "OIHW", "NCHW"))
    y = y + b1.reshape(1, C, 1, 1)
    y = (y - run_mean.reshape(1, C, 1, 1)) / jnp.sqrt(
        run_var.reshape(1, C, 1, 1) + eps)
    y = y * gamma.reshape(1, C, 1, 1) + beta.reshape(1, C, 1, 1)
    y = jnp.where(y > 0, y, 0.1 * y)

    z = lax.conv_general_dilated(
        y, w2_oihw.astype(jnp.float32),
        window_strides=(1, 1), padding="SAME",
        dimension_numbers=("NCHW", "OIHW", "NCHW"))
    z = z + b2.reshape(1, -1, 1, 1)

    z = jnp.transpose(z, (0, 2, 3, 1)).reshape(B, H, W, num_box, num_attr)
    z = z.at[..., 4:].set(jax.nn.sigmoid(z[..., 4:]))
    return z


if __name__ == "__main__":
    B, C, H, W = 2, 32, 16, 16
    num_box, num_class = 3, 3
    D = num_box * (5 + num_class)

    key = jax.random.PRNGKey(0)
    keys = jax.random.split(key, 9)
    x = jax.random.normal(keys[0], (B, C, H, W), dtype=jnp.float32)

    # Deterministic synthetic parameters (shapes from the module __init__).
    w1 = jax.random.normal(keys[1], (C, C, 3, 3), dtype=jnp.float32) * 0.05
    b1 = jax.random.normal(keys[2], (C,), dtype=jnp.float32) * 0.1
    gamma = 1.0 + 0.1 * jax.random.normal(keys[3], (C,), dtype=jnp.float32)
    beta = 0.1 * jax.random.normal(keys[4], (C,), dtype=jnp.float32)
    run_mean = 0.1 * jax.random.normal(keys[5], (C,), dtype=jnp.float32)
    run_var = jax.random.uniform(keys[6], (C,), minval=0.5, maxval=1.5,
                                 dtype=jnp.float32)
    w2 = jax.random.normal(keys[7], (D, C, 1, 1), dtype=jnp.float32) * 0.05
    b2 = jax.random.normal(keys[8], (D,), dtype=jnp.float32) * 0.1
    params = (w1, b1, gamma, beta, run_mean, run_var, w2, b2)

    out = yolo_detector_pallas(x, params, num_box, num_class)
    out = jax.block_until_ready(out)

    ref = yolo_detector_reference(x, params, num_box, num_class)
    assert out.shape == (B, H, W, num_box, 5 + num_class), out.shape
    # bf16 MXU operands -> tolerance loosened vs the pure-f32 reference.
    assert jnp.allclose(out, ref, atol=2e-2, rtol=2e-2), (
        float(jnp.max(jnp.abs(out - ref))))

    print("KERNEL_OK")
</pallas_src>

<mosaic_0001>
module attributes {stable_mosaic.version = 11 : i64} {
  func.func @_detector_kernel(%arg0: i32, %arg1: memref<1x256x288xbf16, #tpu.memory_space<vmem>>, %arg2: memref<288x32xbf16, #tpu.memory_space<vmem>>, %arg3: memref<1x32xf32, #tpu.memory_space<vmem>>, %arg4: memref<1x32xf32, #tpu.memory_space<vmem>>, %arg5: memref<32x128xbf16, #tpu.memory_space<vmem>>, %arg6: memref<1x128xf32, #tpu.memory_space<vmem>>, %arg7: memref<1x128xf32, #tpu.memory_space<vmem>>, %arg8: memref<1x256x128xf32, #tpu.memory_space<vmem>>) attributes {dimension_semantics = [#tpu.dimension_semantics<parallel>], iteration_bounds = array<i64: 2>, scalar_prefetch = 0 : i64, scratch_operands = 0 : i64, tpu.core_type = #tpu.core_type<tc>, window_params = [{transform_indices = @transform_0, window_bounds = array<i64: 1, 256, 288>}, {pipeline_mode = #tpu.pipeline_mode<synchronous>, transform_indices = @transform_1, window_bounds = array<i64: 288, 32>}, {pipeline_mode = #tpu.pipeline_mode<synchronous>, transform_indices = @transform_2, window_bounds = array<i64: 1, 32>}, {pipeline_mode = #tpu.pipeline_mode<synchronous>, transform_indices = @transform_3, window_bounds = array<i64: 1, 32>}, {pipeline_mode = #tpu.pipeline_mode<synchronous>, transform_indices = @transform_4, window_bounds = array<i64: 32, 128>}, {pipeline_mode = #tpu.pipeline_mode<synchronous>, transform_indices = @transform_5, window_bounds = array<i64: 1, 128>}, {pipeline_mode = #tpu.pipeline_mode<synchronous>, transform_indices = @transform_6, window_bounds = array<i64: 1, 128>}, {transform_indices = @transform_7, window_bounds = array<i64: 1, 256, 128>}]} {
    %c0 = arith.constant 0 : index
    %c0_0 = arith.constant 0 : index
    %c0_1 = arith.constant 0 : index
    %0 = vector.load %arg1[%c0, %c0_0, %c0_1] : memref<1x256x288xbf16, #tpu.memory_space<vmem>>, vector<1x256x288xbf16>
    %1 = vector.shape_cast %0 : vector<1x256x288xbf16> to vector<256x288xbf16>
    %c0_2 = arith.constant 0 : index
    %c0_3 = arith.constant 0 : index
    %2 = vector.load %arg2[%c0_2, %c0_3] : memref<288x32xbf16, #tpu.memory_space<vmem>>, vector<288x32xbf16>
    %cst = arith.constant dense<0.000000e+00> : vector<256x32xf32>
    %3 = tpu.matmul %1, %2, %cst {dimension_numbers = #tpu.dot_dimension_numbers<[1], [0], [0], [1], [0, 0, 1, 1], [], []>} : vector<256x288xbf16>, vector<288x32xbf16>, vector<256x32xf32> -> vector<256x32xf32>
    %c0_4 = arith.constant 0 : index
    %c0_5 = arith.constant 0 : index
    %4 = vector.load %arg3[%c0_4, %c0_5] : memref<1x32xf32, #tpu.memory_space<vmem>>, vector<1x32xf32>
    %5 = vector.broadcast %4 : vector<1x32xf32> to vector<256x32xf32>
    %6 = arith.mulf %3, %5 : vector<256x32xf32>
    %c0_6 = arith.constant 0 : index
    %c0_7 = arith.constant 0 : index
    %7 = vector.load %arg4[%c0_6, %c0_7] : memref<1x32xf32, #tpu.memory_space<vmem>>, vector<1x32xf32>
    %8 = vector.broadcast %7 : vector<1x32xf32> to vector<256x32xf32>
    %9 = arith.addf %6, %8 : vector<256x32xf32>
    %cst_8 = arith.constant 0.000000e+00 : f32
    %10 = vector.broadcast %cst_8 : f32 to vector<256x32xf32>
    %11 = arith.cmpf ogt, %9, %10 : vector<256x32xf32>
    %cst_9 = arith.constant 1.000000e-01 : f32
    %12 = vector.broadcast %cst_9 : f32 to vector<256x32xf32>
    %13 = arith.mulf %12, %9 : vector<256x32xf32>
    %14 = arith.select %11, %9, %13 : vector<256x32xi1>, vector<256x32xf32>
    %15 = arith.truncf %14 : vector<256x32xf32> to vector<256x32xbf16>
    %c0_10 = arith.constant 0 : index
    %c0_11 = arith.constant 0 : index
    %16 = vector.load %arg5[%c0_10, %c0_11] : memref<32x128xbf16, #tpu.memory_space<vmem>>, vector<32x128xbf16>
    %cst_12 = arith.constant dense<0.000000e+00> : vector<256x128xf32>
    %17 = tpu.matmul %15, %16, %cst_12 {dimension_numbers = #tpu.dot_dimension_numbers<[1], [0], [0], [1], [0, 0, 1, 1], [], []>} : vector<256x32xbf16>, vector<32x128xbf16>, vector<256x128xf32> -> vector<256x128xf32>
    %c0_13 = arith.constant 0 : index
    %c0_14 = arith.constant 0 : index
    %18 = vector.load %arg6[%c0_13, %c0_14] : memref<1x128xf32, #tpu.memory_space<vmem>>, vector<1x128xf32>
    %19 = vector.broadcast %18 : vector<1x128xf32> to vector<256x128xf32>
    %20 = arith.addf %17, %19 : vector<256x128xf32>
    %c0_15 = arith.constant 0 : index
    %c0_16 = arith.constant 0 : index
    %21 = vector.load %arg7[%c0_15, %c0_16] : memref<1x128xf32, #tpu.memory_space<vmem>>, vector<1x128xf32>
    %cst_17 = arith.constant 5.000000e-01 : f32
    %22 = vector.broadcast %cst_17 : f32 to vector<1x128xf32>
    %23 = arith.cmpf ogt, %21, %22 : vector<1x128xf32>
    %24 = arith.negf %20 : vector<256x128xf32>
    %25 = math.exp %24 : vector<256x128xf32>
    %cst_18 = arith.constant 1.000000e+00 : f32
    %26 = vector.broadcast %cst_18 : f32 to vector<256x128xf32>
    %27 = arith.addf %26, %25 : vector<256x128xf32>
    %28 = arith.divf %26, %27 : vector<256x128xf32>
    %29 = vector.shape_cast %23 : vector<1x128xi1> to vector<1x128xi1>
    %30 = vector.broadcast %29 : vector<1x128xi1> to vector<256x128xi1>
    %31 = arith.select %30, %28, %20 : vector<256x128xi1>, vector<256x128xf32>
    %c0_19 = arith.constant 0 : index
    %c0_20 = arith.constant 0 : index
    %c0_21 = arith.constant 0 : index
    %32 = vector.load %arg8[%c0_19, %c0_20, %c0_21] : memref<1x256x128xf32, #tpu.memory_space<vmem>>, vector<1x256x128xf32>
    %33 = vector.shape_cast %32 : vector<1x256x128xf32> to vector<256x128xf32>
    %34 = vector.shape_cast %31 : vector<256x128xf32> to vector<1x256x128xf32>
    tpu.vector_store %arg8[%c0_19, %c0_20, %c0_21], %34 {strides = array<i32>} : memref<1x256x128xf32, #tpu.memory_space<vmem>>, vector<1x256x128xf32>,
    return
  }
  func.func @transform_0(%arg0: i32) -> (i32, i32, i32) {
    %c0_i32 = arith.constant 0 : i32
    %c0_i32_0 = arith.constant 0 : i32
    %c0_i32_1 = arith.constant 0 : i32
    return %arg0, %c0_i32, %c0_i32_0 : i32, i32, i32
  }
  func.func @transform_1(%arg0: i32) -> (i32, i32) {
    %c0_i32 = arith.constant 0 : i32
    %c0_i32_0 = arith.constant 0 : i32
    %c0_i32_1 = arith.constant 0 : i32
    return %c0_i32, %c0_i32_0 : i32, i32
  }
  func.func @transform_2(%arg0: i32) -> (i32, i32) {
    %c0_i32 = arith.constant 0 : i32
    %c0_i32_0 = arith.constant 0 : i32
    %c0_i32_1 = arith.constant 0 : i32
    return %c0_i32, %c0_i32_0 : i32, i32
  }
  func.func @transform_3(%arg0: i32) -> (i32, i32) {
    %c0_i32 = arith.constant 0 : i32
    %c0_i32_0 = arith.constant 0 : i32
    %c0_i32_1 = arith.constant 0 : i32
    return %c0_i32, %c0_i32_0 : i32, i32
  }
  func.func @transform_4(%arg0: i32) -> (i32, i32) {
    %c0_i32 = arith.constant 0 : i32
    %c0_i32_0 = arith.constant 0 : i32
    %c0_i32_1 = arith.constant 0 : i32
    return %c0_i32, %c0_i32_0 : i32, i32
  }
  func.func @transform_5(%arg0: i32) -> (i32, i32) {
    %c0_i32 = arith.constant 0 : i32
    %c0_i32_0 = arith.constant 0 : i32
    %c0_i32_1 = arith.constant 0 : i32
    return %c0_i32, %c0_i32_0 : i32, i32
  }
  func.func @transform_6(%arg0: i32) -> (i32, i32) {
    %c0_i32 = arith.constant 0 : i32
    %c0_i32_0 = arith.constant 0 : i32
    %c0_i32_1 = arith.constant 0 : i32
    return %c0_i32, %c0_i32_0 : i32, i32
  }
  func.func @transform_7(%arg0: i32) -> (i32, i32, i32) {
    %c0_i32 = arith.constant 0 : i32
    %c0_i32_0 = arith.constant 0 : i32
    %c0_i32_1 = arith.constant 0 : i32
    return %arg0, %c0_i32, %c0_i32_0 : i32, i32, i32
  }
}

</mosaic_0001>

<bundles_post_ra>
// kernel: tpu_custom_call.1
= control target key start
LH: loop header
LB: loop body
LE: loop exit
PB: predicated region body
PF: predicated region fallthrough
CT: control target
= control target key end

     0   :  { %12 = vsyncpa [#allocation3], 0  ;;  %s3228_s0 = inlined_call_operand.vmem [shape: bf16[2,256,288], index: 0, kind: input, shape index: {}]   ;;  %s3229_s1 = inlined_call_operand.vmem [shape: bf16[288,32], index: 1, kind: input, shape index: {}]   ;;  %s3230_s2 = inlined_call_operand.vmem [shape: f32[1,32], index: 2, kind: input, shape index: {}]   ;;  %s3231_s3 = inlined_call_operand.vmem [shape: f32[1,32], index: 3, kind: input, shape index: {}]   ;;  %s3232_s4 = inlined_call_operand.vmem [shape: bf16[32,128], index: 4, kind: input, shape index: {}]   ;;  %s3233_s5 = inlined_call_operand.vmem [shape: f32[1,128], index: 5, kind: input, shape index: {}]   ;;  %s3234_s6 = inlined_call_operand.vmem [shape: f32[1,128], index: 6, kind: input, shape index: {}]   ;;  %s3235_s7 = inlined_call_operand.hbm [shape: f32[2,256,128], index: 7, kind: output, shape index: {}]  }
   0x1   :  { %14 = vsyncpa [#allocation3 + $0x1], 0  ;;  %s2589_s24 = smov 0   ;;  %s2591_s25 = smov 0  }
   0x2   :  { %s2593_s26 = smov 0   ;;  %s2595_s27 = smov 0  }
   0x3 LB: > { %s2610_s28 = sadd.s32 4294967295, %s2543_s27   ;;  %s1859_s29 = sadd.s32 4294967294, %s2543_s27   ;;  %s2543_s27 = sphi %s2595_s27, %s3241_s27   ;;  %s2539_s26 = sphi %s2593_s26, %s3240_s26   ;;  %s2535_s25 = sphi %s2591_s25, %s3239_s25   ;;  %s2531_s24 = sphi %s2589_s24, %s3238_s24  }
   0x4   : > { %s2614_s30 = sadd.s32 1, %s2543_s27   ;;  %s179_s8 = sadd.s32 1, %s2539_s26 }
   0x5   : > { %s176_s9 = ssub.s32 %s2543_s27, %s2614_s30  ;;  %p189_p0 = scmp.ne.s32.totalorder %s2539_s26, %s2535_s25 }
   0x6   : > { %p177_p1 = scmp.eq.s32.totalorder %s176_s9, 0  ;;  %p190_p2 = scmp.eq.s32.totalorder %s2610_s28, 1 }
   0x7   : > { %p195_p3 = scmp.ne.s32.totalorder %s2535_s25, %s2531_s24  ;;  %p196_p4 = scmp.eq.s32.totalorder %s1859_s29, 1 }
   0x8   : > { %s2625_s10 = scalar_select %p177_p1, %s2539_s26, %s179_s8  }
   0x9   : > { %p2627_p5 = por %p190_p2, %p189_p0  ;;  %p2631_p6 = por %p196_p4, %p195_p3 }
   0xa   : > { %p1862_p7 = scmp.ge.s32.totalorder %s2543_s27, 1  ;;  %p240_p8 = scmp.lt.s32.totalorder %s2543_s27, 3 }
   0xc   : > { %p241_p9 = pnand %p1862_p7, %p240_p8 }
   0xd   : > { %v2269_v0 = vld [vmem:[%s3229_s1 + $0x40] sm:$0xff] (!%p241_p9)   ;;  %v2271_v2 = vld [vmem:[%s3229_s1 + $0x48] sm:$0xff] (!%p241_p9)   ;;  %v2273_v4 = vld [vmem:[%s3229_s1 + $0x50] sm:$0xff] (!%p241_p9)   ;;  %p272_p10 = scmp.lt.s32.totalorder (!%p241_p9), %s2610_s28, 1  ;;  %vm726_vm0 = vcmask (!%p241_p9), 261120   ;;  %s269_s29 = sand.u32 (!%p241_p9), 1, %s2535_s25  }
   0xe   : > { %244 = sbr.rel (%p241_p9) target bundleno = 655 (0x28f), region = 48  ;;  %v2270_v1 = vld [vmem:[%s3229_s1] sm:$0xff] (!%p241_p9)   ;;  %2006 = vmatprep.subr.bf16.mxu0 (!%p241_p9), %v2269_v0  ;;  %v2272_v3 = vld [vmem:[%s3229_s1 + $0x8] sm:$0xff] (!%p241_p9)   ;;  %v2274_v5 = vld [vmem:[%s3229_s1 + $0x10] sm:$0xff] (!%p241_p9)   ;;  %s1863_s8 = sshll.u32 (!%p241_p9), %s269_s29, 8 }
   0xf   : > { %2007 = vmatpush3.bf16.msra.mxu0 (!%p241_p9), %v2270_v1  ;;  %v2275_v6 = vld [vmem:[%s3229_s1 + $0x58] sm:$0xff] (!%p241_p9)   ;;  %v2277_v8 = vld [vmem:[%s3229_s1 + $0x60] sm:$0xff] (!%p241_p9)   ;;  %v2279_v11 = vld [vmem:[%s3229_s1 + $0x68] sm:$0xff] (!%p241_p9)   ;;  %s2972_s9 = scalar_lea.vmem (!%p241_p9), [#allocation2], %s1863_s8  ;;  %s2546_s20 = smov (!%p241_p9), [#allocation2]  }
  0x10   : > { %2008 = vmatprep.subr.bf16.mxu0 (!%p241_p9), %v2271_v2  ;;  %v2276_v7 = vld [vmem:[%s3229_s1 + $0x18] sm:$0xff] (!%p241_p9)   ;;  %v2283_v9 = vld [vmem:[%s3229_s1 + $0x80] sm:$0xff] (!%p241_p9)   ;;  %v2280_v12 = vld [vmem:[%s3229_s1 + $0x28] sm:$0xff] (!%p241_p9)   ;;  %s1797_s15 = sshll.u32 (!%p241_p9), %s2972_s9, 4  ;;  %s3177_s15 = int_to_ptr.vmem [resolvable:$true] %s1797_s15 }
  0x11   : > { %v2278_v10 = vld [vmem:[%s3229_s1 + $0x20] sm:$0xff] (!%p241_p9)   ;;  %2154 = vmatprep.subr.bf16.mxu1 (!%p241_p9), %v2283_v9  ;;  %v2286_v13 = vld [vmem:[%s3229_s1 + $0x88] sm:$0xff] (!%p241_p9)   ;;  %v2281_v14 = vld [vmem:[%s3229_s1 + $0x70] sm:$0xff] (!%p241_p9)  }
  0x12   : > { %2155 = vmatpush3.bf16.msra.mxu1 (!%p241_p9), %v2283_v9  ;;  %v2282_v18 = vld [vmem:[%s3229_s1 + $0x30] sm:$0xff] (!%p241_p9)   ;;  %v2284_v19 = vld [vmem:[%s3229_s1 + $0x78] sm:$0xff] (!%p241_p9)   ;;  %v2351_v61 = vld [vmem:[%s3232_s4] sm:$0xff] (!%p241_p9)  }
  0x13   : > { %2009 = vmatpush3.bf16.msra.mxu0 (!%p241_p9), %v2272_v3  ;;  %2156 = vmatprep.subr.bf16.mxu1 (!%p241_p9), %v2286_v13  ;;  %v2285_v21 = vld [vmem:[%s3229_s1 + $0x38] sm:$0xff] (!%p241_p9)   ;;  %v2352_v0 = vld [vmem:[%s3232_s4 + $0x8] sm:$0xff] (!%p241_p9)  }
  0x14   : > { %2010 = vmatprep.subr.bf16.mxu0 (!%p241_p9), %v2273_v4 }
  0x15   : > { %s273_s13 = scalar_select %p272_p10, %s2610_s28, 1 }
  0x16   : > { %2157 = vmatpush3.bf16.msra.mxu1 %v2286_v13 }
  0x17   : > { %2011 = vmatpush3.bf16.msra.mxu0 %v2274_v5  ;;  %s2226_s18 = smul.u32 384, %s273_s13  ;;  %2190 = vmatprep.subr.bf16.mxu1 %v2351_v61  ;;  %s2005_s13 = sshll.u32 %s2610_s28, 12 }
  0x18   : > { %2012 = vmatprep.subr.bf16.mxu0 %v2275_v6  ;;  %s3175_s19 = scalar_lea.hbm %s3235_s7, %s2005_s13  ;;  %s3187_s28 = scalar_lea.sflag [#allocation3], %s269_s29 }
  0x19   : > { %s2678_s14 = scalar_lea.vmem %s3228_s0, %s2226_s18  ;;  %s2485_s18 = sshll.u32 %s2546_s20, 4  ;;  %s2486_s18 = int_to_ptr.vmem [resolvable:$false] %s2485_s18 }
  0x1a   : > { %v2289_v15 = vld [vmem:[%s2678_s14 + $0x4] ss:$12 sps:$4 sm:$0xff]   ;;  %v2290_v16 = vld [vmem:[%s2678_s14 + $0x8] ss:$12 sps:$4 sm:$0xff]   ;;  %v2291_v17 = vld [vmem:[%s2678_s14 + $0x20] ss:$12 sps:$4 sm:$0xff]   ;;  %p2488_p0 = scmp.lt.s32.totalorder %s3177_s15, %s2486_s18 }
  0x1b   : > { %2013 = vmatpush3.bf16.msra.mxu0 %v2276_v7  ;;  %807 = vmatprep.mubr.bf16.mxu0 %v2289_v15  ;;  %v2298_v20 = vld [vmem:[%s2678_s14 + $0x38] ss:$12 sps:$4 sm:$0xff]   ;;  %v2299_v22 = vld [vmem:[%s2678_s14 + $0x50] ss:$12 sps:$4 sm:$0xff]   ;;  %v2306_v23 = vld [vmem:[%s2678_s14 + $0x68] ss:$12 sps:$4 sm:$0xff]  }
  0x1c   : > { %2014 = vmatprep.subr.bf16.mxu0 %v2277_v8  ;;  %2158 = vmatprep.mubr.msk.bf16.mxu1 %vm726_vm0, %v2290_v16  ;;  %v2287_v24 = vld [vmem:[%s2678_s14] ss:$12 sps:$4 sm:$0xff]   ;;  %v2292_v25 = vld [vmem:[%s2678_s14 + $0x1c] ss:$12 sps:$4 sm:$0xff]   ;;  %v2314_v27 = vld [vmem:[%s2678_s14 + $0x98] ss:$12 sps:$4 sm:$0xff]  }
  0x1d   : > { %2159 = vmatmul.mubr.msk.bf16.vlgmr.msra.gmra.mrb[0].mxu1 %vm726_vm0, %v2291_v17  ;;  %v2307_v26 = vld [vmem:[%s2678_s14 + $0x80] ss:$12 sps:$4 sm:$0xff]   ;;  %v2294_v28 = vld [vmem:[%s2678_s14 + $0x18] ss:$12 sps:$4 sm:$0xff]   ;;  %v2315_v30 = vld [vmem:[%s2678_s14 + $0xb0] ss:$12 sps:$4 sm:$0xff]  }
  0x1e   : > { %2162 = vmatprep.mubr.msk.bf16.mxu1 %vm726_vm0, %v2298_v20  ;;  %v2295_v29 = vld [vmem:[%s2678_s14 + $0x34] ss:$12 sps:$4 sm:$0xff]   ;;  %v2297_v32 = vld [vmem:[%s2678_s14 + $0x30] ss:$12 sps:$4 sm:$0xff]   ;;  %v2300_v33 = vld [vmem:[%s2678_s14 + $0x4c] ss:$12 sps:$4 sm:$0xff]   ;;  %2191 = vmatpush3.bf16.msra.mxu1 %v2351_v61 }
  0x1f   : > { %2015 = vmatpush3.bf16.msra.mxu0 %v2278_v10  ;;  %v2322_v31 = vld [vmem:[%s2678_s14 + $0xc8] ss:$12 sps:$4 sm:$0xff]   ;;  %v2323_v34 = vld [vmem:[%s2678_s14 + $0xe0] ss:$12 sps:$4 sm:$0xff]   ;;  %v2330_v35 = vld [vmem:[%s2678_s14 + $0xf8] ss:$12 sps:$4 sm:$0xff]   ;;  %2192 = vmatprep.subr.bf16.mxu1 %v2352_v0 }
  0x20   : > { %2016 = vmatprep.subr.bf16.mxu0 %v2279_v11  ;;  %v2302_v36 = vld [vmem:[%s2678_s14 + $0x48] ss:$12 sps:$4 sm:$0xff]   ;;  %v2303_v37 = vld [vmem:[%s2678_s14 + $0x64] ss:$12 sps:$4 sm:$0xff]   ;;  %v2305_v40 = vld [vmem:[%s2678_s14 + $0x60] ss:$12 sps:$4 sm:$0xff]  }
  0x21   : > { %v2331_v38 = vld [vmem:[%s2678_s14 + $0x110] ss:$12 sps:$4 sm:$0xff]   ;;  %v2338_v39 = vld [vmem:[%s2678_s14 + $0x128] ss:$12 sps:$4 sm:$0xff]   ;;  %v2339_v42 = vld [vmem:[%s2678_s14 + $0x140] ss:$12 sps:$4 sm:$0xff]  }
  0x22   : > { %v2308_v41 = vld [vmem:[%s2678_s14 + $0x7c] ss:$12 sps:$4 sm:$0xff]   ;;  %v2346_v43 = vld [vmem:[%s2678_s14 + $0x158] ss:$12 sps:$4 sm:$0xff]   ;;  %v2311_v45 = vld [vmem:[%s2678_s14 + $0x94] ss:$12 sps:$4 sm:$0xff]   ;;  %2193 = vmatpush3.bf16.msra.mxu1 %v2352_v0 }
  0x23   : > { %2017 = vmatpush3.bf16.msra.mxu0 %v2280_v12  ;;  %v2310_v44 = vld [vmem:[%s2678_s14 + $0x78] ss:$12 sps:$4 sm:$0xff]   ;;  %v2347_v46 = vld [vmem:[%s2678_s14 + $0x170] ss:$12 sps:$4 sm:$0xff]   ;;  %v2318_v49 = vld [vmem:[%s2678_s14 + $0xa8] ss:$12 sps:$4 sm:$0xff]  }
  0x24   : > { %2018 = vmatprep.subr.bf16.mxu0 %v2281_v14  ;;  %v2313_v47 = vld [vmem:[%s2678_s14 + $0x90] ss:$12 sps:$4 sm:$0xff]   ;;  %v2316_v48 = vld [vmem:[%s2678_s14 + $0xac] ss:$12 sps:$4 sm:$0xff]   ;;  %v2327_v54 = vld [vmem:[%s2678_s14 + $0xf4] ss:$12 sps:$4 sm:$0xff]  }
  0x25   : > { %2163 = vmatmul.mubr.msk.bf16.gmra.mrb[4].mxu1 %vm726_vm0, %v2299_v22  ;;  %v2319_v50 = vld [vmem:[%s2678_s14 + $0xc4] ss:$12 sps:$4 sm:$0xff]   ;;  %v2321_v51 = vld [vmem:[%s2678_s14 + $0xc0] ss:$12 sps:$4 sm:$0xff]   ;;  %v2324_v52 = vld [vmem:[%s2678_s14 + $0xdc] ss:$12 sps:$4 sm:$0xff]  }
  0x26   : > { %2166 = vmatprep.mubr.msk.bf16.mxu1 %vm726_vm0, %v2306_v23  ;;  %v2326_v53 = vld [vmem:[%s2678_s14 + $0xd8] ss:$12 sps:$4 sm:$0xff]   ;;  %v2329_v55 = vld [vmem:[%s2678_s14 + $0xf0] ss:$12 sps:$4 sm:$0xff]   ;;  %v2334_v57 = vld [vmem:[%s2678_s14 + $0x108] ss:$12 sps:$4 sm:$0xff]  }
  0x27   : > { %2019 = vmatpush3.bf16.msra.mxu0 %v2282_v18  ;;  %v2332_v56 = vld [vmem:[%s2678_s14 + $0x10c] ss:$12 sps:$4 sm:$0xff]   ;;  %v2335_v58 = vld [vmem:[%s2678_s14 + $0x124] ss:$12 sps:$4 sm:$0xff]   ;;  %v2340_v60 = vld [vmem:[%s2678_s14 + $0x13c] ss:$12 sps:$4 sm:$0xff]  }
  0x28   : > { %2020 = vmatprep.subr.bf16.mxu0 %v2284_v19  ;;  %v2337_v59 = vld [vmem:[%s2678_s14 + $0x120] ss:$12 sps:$4 sm:$0xff]   ;;  %v2342_v62 = vld [vmem:[%s2678_s14 + $0x138] ss:$12 sps:$4 sm:$0xff]   ;;  %v2345_v1 = vld [vmem:[%s2678_s14 + $0x150] ss:$12 sps:$4 sm:$0xff]  }
  0x29   : > { %v2343_v63 = vld [vmem:[%s2678_s14 + $0x154] ss:$12 sps:$4 sm:$0xff]   ;;  %v2348_v2 = vld [vmem:[%s2678_s14 + $0x16c] ss:$12 sps:$4 sm:$0xff]   ;;  %s2487_s21 = scalar_lea.vmem %s2486_s18, 8192 }
  0x2a   : > { %v2350_v3 = vld [vmem:[%s2678_s14 + $0x168] ss:$12 sps:$4 sm:$0xff]   ;;  %v2775_v17 = vld [vmem:[%s3230_s2] ss:$0 sm:$0xff]  ;;  %s2481_s14 = scalar_lea.vmem %s3177_s15, 4096 }
  0x2b   : > { %2021 = vmatpush3.bf16.msra.mxu0 %v2285_v21  ;;  %v2780_v20 = vld [vmem:[%s3231_s3] ss:$0 sm:$0xff]  ;;  %p2482_p11 = scmp.ne.s32.totalorder %s3177_s15, %s2481_s14  ;;  %p2489_p1 = scmp.lt.s32.totalorder %s2487_s21, %s2481_s14 }
  0x2d   : > { %2167 = vmatmul.mubr.msk.bf16.gmra.mrb[8].mxu1 %vm726_vm0, %v2307_v26  ;;  %p2483_p12 = pnand %p2482_p11, %p2627_p5  ;;  %p2490_p2 = por %p2489_p1, %p2488_p0 }
  0x2e   : > { %808 = vmatmul.mubr.bf16.vlgmr.msra.gmra.mrb[0].mxu0 %v2287_v24  ;;  %2170 = vmatprep.mubr.msk.bf16.mxu1 %vm726_vm0, %v2314_v27 }
  0x2f   : > { %815 = vmatprep.mubr.bf16.mxu0 %v2292_v25  ;;  %p2484_p13 = pneg %p2483_p12 }
  0x31   : > { %p2491_p3 = pnand %p2490_p2, %p2484_p13 }
  0x35   : > { %2171 = vmatmul.mubr.msk.bf16.gmra.mrb[12].mxu1 %vm726_vm0, %v2315_v30 }
  0x36   : > { %816 = vmatmul.mubr.bf16.gmra.mrb[4].mxu0 %v2294_v28  ;;  %2174 = vmatprep.mubr.msk.bf16.mxu1 %vm726_vm0, %v2322_v31 }
  0x37   : > { %823 = vmatprep.mubr.bf16.mxu0 %v2295_v29 }
  0x3d   : > { %2175 = vmatmul.mubr.msk.bf16.gmra.mrb[16].mxu1 %vm726_vm0, %v2323_v34 }
  0x3e   : > { %824 = vmatmul.mubr.bf16.gmra.mrb[8].mxu0 %v2297_v32  ;;  %2178 = vmatprep.mubr.msk.bf16.mxu1 %vm726_vm0, %v2330_v35 }
  0x3f   : > { %831 = vmatprep.mubr.bf16.mxu0 %v2300_v33 }
  0x45   : > { %2179 = vmatmul.mubr.msk.bf16.gmra.mrb[20].mxu1 %vm726_vm0, %v2331_v38 }
  0x46   : > { %832 = vmatmul.mubr.bf16.gmra.mrb[12].mxu0 %v2302_v36  ;;  %2182 = vmatprep.mubr.msk.bf16.mxu1 %vm726_vm0, %v2338_v39 }
  0x47   : > { %839 = vmatprep.mubr.bf16.mxu0 %v2303_v37 }
  0x4d   : > { %2183 = vmatmul.mubr.msk.bf16.gmra.mrb[24].mxu1 %vm726_vm0, %v2339_v42 }
  0x4e   : > { %840 = vmatmul.mubr.bf16.gmra.mrb[16].mxu0 %v2305_v40  ;;  %2186 = vmatprep.mubr.msk.bf16.mxu1 %vm726_vm0, %v2346_v43 }
  0x4f   : > { %847 = vmatprep.mubr.bf16.mxu0 %v2308_v41 }
  0x55   : > { %2187 = vmatmul.mubr.msk.bf16.gmra.mrb[28].mxu1 %vm726_vm0, %v2347_v46 }
  0x56   : > { %848 = vmatmul.mubr.bf16.gmra.mrb[20].mxu0 %v2310_v44 }
  0x57   : > { %855 = vmatprep.mubr.bf16.mxu0 %v2311_v45 }
  0x5e   : > { %856 = vmatmul.mubr.bf16.gmra.mrb[24].mxu0 %v2313_v47 }
  0x5f   : > { %863 = vmatprep.mubr.bf16.mxu0 %v2316_v48 }
  0x66   : > { %864 = vmatmul.mubr.bf16.gmra.mrb[28].mxu0 %v2318_v49 }
  0x67   : > { %871 = vmatprep.mubr.bf16.mxu0 %v2319_v50 }
  0x6e   : > { %872 = vmatmul.mubr.bf16.gmra.mrb[32].mxu0 %v2321_v51 }
  0x6f   : > { %879 = vmatprep.mubr.bf16.mxu0 %v2324_v52 }
  0x76   : > { %880 = vmatmul.mubr.bf16.gmra.mrb[36].mxu0 %v2326_v53 }
  0x77   : > { %887 = vmatprep.mubr.bf16.mxu0 %v2327_v54 }
  0x7e   : > { %888 = vmatmul.mubr.bf16.gmra.mrb[40].mxu0 %v2329_v55 }
  0x7f   : > { %895 = vmatprep.mubr.bf16.mxu0 %v2332_v56 }
  0x86   : > { %896 = vmatmul.mubr.bf16.gmra.mrb[44].mxu0 %v2334_v57 }
  0x87   : > { %903 = vmatprep.mubr.bf16.mxu0 %v2335_v58 }
  0x8e   : > { %904 = vmatmul.mubr.bf16.gmra.mrb[48].mxu0 %v2337_v59 }
  0x8f   : > { %911 = vmatprep.mubr.bf16.mxu0 %v2340_v60 }
  0x96   : > { %912 = vmatmul.mubr.bf16.gmra.mrb[52].mxu0 %v2342_v62 }
  0x97   : > { %919 = vmatprep.mubr.bf16.mxu0 %v2343_v63 }
  0x9e   : > { %920 = vmatmul.mubr.bf16.gmra.mrb[56].mxu0 %v2345_v1 }
  0x9f   : > { %927 = vmatprep.mubr.bf16.mxu0 %v2348_v2 }
  0xa6   : > { %928 = vmatmul.mubr.bf16.gmra.mrb[60].mxu0 %v2350_v3 }
  0xf0   : > { %v2160_v4 = vpop.f32.mrb[0].mxu1 }
  0xf1   : > { %v970_v5 = vpop.f32.mrb[1].mxu1 }
  0xf2   : > { %v2161_v6 = vpop.f32.mrb[2].mxu1 }
  0xf3   : > { %v973_v7 = vpop.f32.mrb[3].mxu1 }
  0xf8   : > { %v2768_v8 = vpop.f32.mrb[4].mxu1 }
  0xf9   : > { %v986_v9 = vpop.f32.mrb[5].mxu1 }
  0xfa   : > { %v2770_v11 = vpop.f32.mrb[6].mxu1 }
  0xfb   : > { %v989_v13 = vpop.f32.mrb[7].mxu1 }
 0x100   : > { %v2783_v23 = vpop.f32.mrb[8].mxu1 }
 0x101   : > { %v2022_v10 = vpop.f32.mrb[0].mxu0  ;;  %v2785_v24 = vpop.f32.mrb[9].mxu1 }
 0x102   : > { %v2023_v12 = vpop.f32.mrb[1].mxu0  ;;  %v2789_v28 = vpop.f32.mrb[10].mxu1 }
 0x103   : > { %v2024_v14 = vadd.f32 %v2023_v12, %v2022_v10  ;;  %v2025_v15 = vpop.f32.mrb[2].mxu0  ;;  %v2791_v30 = vpop.f32.mrb[11].mxu1 }
 0x104   : > { %v2026_v16 = vpop.f32.mrb[3].mxu0 }
 0x105   : > { %v2027_v18 = vadd.f32 %v2026_v16, %v2025_v15  ;;  %v971_v19 = vadd.f32 %v2024_v14, %v970_v5 }
 0x107   : > { %v1104_v21 = vmul.f32 %v2775_v17, %v971_v19  ;;  %v974_v22 = vadd.f32 %v2027_v18, %v973_v7 }
 0x108   : > { %v2795_v43 = vpop.f32.mrb[12].mxu1 }
 0x109   : > { %v1143_v25 = vadd.f32 %v2780_v20, %v1104_v21  ;;  %v1105_v26 = vmul.f32 %v2775_v17, %v974_v22  ;;  %v2028_v27 = vpop.f32.mrb[4].mxu0  ;;  %v2797_v45 = vpop.f32.mrb[13].mxu1 }
 0x10a   : > { %v2029_v29 = vpop.f32.mrb[5].mxu0  ;;  %v2801_v49 = vpop.f32.mrb[14].mxu1 }
 0x10b   : > { %v1207_v31 = vmul.f32 0.1, %v1143_v25  ;;  %v1144_v32 = vadd.f32 %v2780_v20, %v1105_v26  ;;  %v2030_v33 = vadd.f32 %v2029_v29, %v2028_v27  ;;  %v2031_v34 = vpop.f32.mrb[6].mxu0  ;;  %vm1175_vm1 = vcmp.gt.f32.partialorder %v1143_v25, 0.0  ;;  %v2804_v51 = vpop.f32.mrb[15].mxu1 }
 0x10c   : > { %v2032_v35 = vpop.f32.mrb[7].mxu0 }
 0x10d   : > { %vm1176_vm2 = vcmp.gt.f32.partialorder %v1144_v32, 0.0  ;;  %v1208_v36 = vmul.f32 0.1, %v1144_v32  ;;  %v979_v37 = vadd.f32 %v2160_v4, %v2030_v33  ;;  %v2033_v38 = vadd.f32 %v2032_v35, %v2031_v34 }
 0x10e   : > { %v1239_v41 = vsel %vm1175_vm1, %v1143_v25, %v1207_v31 }
 0x10f   : > { %v1106_v39 = vmul.f32 %v2775_v17, %v979_v37  ;;  %v982_v40 = vadd.f32 %v2161_v6, %v2033_v38  ;;  %v1240_v42 = vsel %vm1176_vm2, %v1144_v32, %v1208_v36 }
 0x110   : > { %v1271_v44 = vpack.c.bf16 %v1240_v42, %v1239_v41  ;;  %v2807_v63 = vpop.f32.mrb[16].mxu1 }
 0x111   : > { %v1145_v46 = vadd.f32 %v2780_v20, %v1106_v39  ;;  %v1107_v47 = vmul.f32 %v2775_v17, %v982_v40  ;;  %v2034_v48 = vpop.f32.mrb[8].mxu0  ;;  %v2810_v2 = vpop.f32.mrb[17].mxu1 }
 0x112   : > { %v2035_v50 = vpop.f32.mrb[9].mxu0  ;;  %2194 = vmatprep.mubr.msk.bf16.mxu1 %vm726_vm0, %v1271_v44  ;;  %v2813_v5 = vpop.f32.mrb[18].mxu1 }
 0x113   : > { %v1209_v52 = vmul.f32 0.1, %v1145_v46  ;;  %v1146_v53 = vadd.f32 %v2780_v20, %v1107_v47  ;;  %v2036_v54 = vadd.f32 %v2035_v50, %v2034_v48  ;;  %v2037_v55 = vpop.f32.mrb[10].mxu0  ;;  %vm1177_vm3 = vcmp.gt.f32.partialorder %v1145_v46, 0.0 }
 0x114   : > { %v2038_v56 = vpop.f32.mrb[11].mxu0 }
 0x115   : > { %vm1178_vm4 = vcmp.gt.f32.partialorder %v1146_v53, 0.0  ;;  %v1210_v57 = vmul.f32 0.1, %v1146_v53  ;;  %v2039_v58 = vadd.f32 %v2038_v56, %v2037_v55  ;;  %v987_v59 = vadd.f32 %v2036_v54, %v986_v9  ;;  %v2817_v9 = vpop.f32.mrb[19].mxu1 }
 0x116   : > { %v1241_v60 = vsel %vm1177_vm3, %v1145_v46, %v1209_v52 }
 0x117   : > { %v1242_v61 = vsel %vm1178_vm4, %v1146_v53, %v1210_v57  ;;  %v990_v62 = vadd.f32 %v2039_v58, %v989_v13  ;;  %v1108_v1 = vmul.f32 %v2775_v17, %v987_v59 }
 0x118   : > { %v1272_v0 = vpack.c.bf16 %v1242_v61, %v1241_v60  ;;  %v2823_v27 = vpop.f32.mrb[20].mxu1 }
 0x119   : > { %v1109_v3 = vmul.f32 %v2775_v17, %v990_v62  ;;  %v2040_v4 = vpop.f32.mrb[12].mxu0  ;;  %v1147_v6 = vadd.f32 %v2780_v20, %v1108_v1  ;;  %v2825_v31 = vpop.f32.mrb[21].mxu1 }
 0x11a   : > { %v2041_v7 = vpop.f32.mrb[13].mxu0  ;;  %2195 = vmatmul.mubr.msk.bf16.vlgmr.msra.gmra.mrb[32].mxu1 %vm726_vm0, %v1272_v0  ;;  %v2829_v35 = vpop.f32.mrb[22].mxu1 }
 0x11b   : > { %v1148_v10 = vadd.f32 %v2780_v20, %v1109_v3  ;;  %v2042_v12 = vadd.f32 %v2041_v7, %v2040_v4  ;;  %v2043_v13 = vpop.f32.mrb[14].mxu0  ;;  %vm1179_vm5 = vcmp.gt.f32.partialorder %v1147_v6, 0.0  ;;  %v1211_v14 = vmul.f32 0.1, %v1147_v6  ;;  %v2832_v36 = vpop.f32.mrb[23].mxu1 }
 0x11c   : > { %v2044_v15 = vpop.f32.mrb[15].mxu0 }
 0x11d   : > { %vm1180_vm6 = vcmp.gt.f32.partialorder %v1148_v10, 0.0  ;;  %v1212_v16 = vmul.f32 0.1, %v1148_v10  ;;  %v995_v18 = vadd.f32 %v2768_v8, %v2042_v12  ;;  %v2045_v19 = vadd.f32 %v2044_v15, %v2043_v13 }
 0x11e   : > { %v1243_v25 = vsel %vm1179_vm5, %v1147_v6, %v1211_v14 }
 0x11f   : > { %v1110_v21 = vmul.f32 %v2775_v17, %v995_v18  ;;  %v998_v22 = vadd.f32 %v2770_v11, %v2045_v19  ;;  %v1244_v26 = vsel %vm1180_vm6, %v1148_v10, %v1212_v16 }
 0x120   : > { %v1273_v29 = vpack.c.bf16 %v1244_v26, %v1243_v25  ;;  %v2838_v52 = vpop.f32.mrb[24].mxu1 }
 0x121   : > { %v1149_v32 = vadd.f32 %v2780_v20, %v1110_v21  ;;  %v1111_v33 = vmul.f32 %v2775_v17, %v998_v22  ;;  %v2046_v34 = vpop.f32.mrb[16].mxu0  ;;  %v2840_v54 = vpop.f32.mrb[25].mxu1 }
 0x122   : > { %v2047_v8 = vpop.f32.mrb[17].mxu0  ;;  %2198 = vmatprep.mubr.msk.bf16.mxu1 %vm726_vm0, %v1273_v29  ;;  %v2844_v58 = vpop.f32.mrb[26].mxu1 }
 0x123   : > { %v1213_v11 = vmul.f32 0.1, %v1149_v32  ;;  %v1150_v37 = vadd.f32 %v2780_v20, %v1111_v33  ;;  %v2048_v38 = vadd.f32 %v2047_v8, %v2046_v34  ;;  %v2049_v39 = vpop.f32.mrb[18].mxu0  ;;  %vm1181_vm7 = vcmp.gt.f32.partialorder %v1149_v32, 0.0  ;;  %v2847_v59 = vpop.f32.mrb[27].mxu1 }
 0x124   : > { %v2050_v40 = vpop.f32.mrb[19].mxu0 }
 0x125   : > { %v1214_v41 = vmul.f32 0.1, %v1150_v37  ;;  %v2051_v42 = vadd.f32 %v2050_v40, %v2049_v39  ;;  %v1003_v44 = vadd.f32 %v2048_v38, %v2785_v24  ;;  %vm1182_vm8 = vcmp.gt.f32.partialorder %v1150_v37, 0.0 }
 0x126   : > { %v1245_v48 = vsel %vm1181_vm7, %v1149_v32, %v1213_v11 }
 0x127   : > { %v1112_v46 = vmul.f32 %v2775_v17, %v1003_v44  ;;  %v1006_v47 = vadd.f32 %v2051_v42, %v2791_v30  ;;  %v1246_v50 = vsel %vm1182_vm8, %v1150_v37, %v1214_v41 }
 0x128   : > { %v1274_v53 = vpack.c.bf16 %v1246_v50, %v1245_v48  ;;  %v2853_v13 = vpop.f32.mrb[28].mxu1 }
 0x129   : > { %v1151_v55 = vadd.f32 %v2780_v20, %v1112_v46  ;;  %v1113_v56 = vmul.f32 %v2775_v17, %v1006_v47  ;;  %v2052_v57 = vpop.f32.mrb[20].mxu0  ;;  %v2855_v15 = vpop.f32.mrb[29].mxu1 }
 0x12a   : > { %v2053_v24 = vpop.f32.mrb[21].mxu0  ;;  %2199 = vmatmul.mubr.msk.bf16.gmra.mrb[36].mxu1 %vm726_vm0, %v1274_v53  ;;  %v2859_v21 = vpop.f32.mrb[30].mxu1 }
 0x12b   : > { %v1215_v30 = vmul.f32 0.1, %v1151_v55  ;;  %v1152_v60 = vadd.f32 %v2780_v20, %v1113_v56  ;;  %v2054_v61 = vadd.f32 %v2053_v24, %v2052_v57  ;;  %v2055_v62 = vpop.f32.mrb[22].mxu0  ;;  %vm1183_vm9 = vcmp.gt.f32.partialorder %v1151_v55, 0.0  ;;  %v2862_v22 = vpop.f32.mrb[31].mxu1 }
 0x12c   : > { %v2056_v0 = vpop.f32.mrb[23].mxu0 }
 0x12d   : > { %vm1184_vm10 = vcmp.gt.f32.partialorder %v1152_v60, 0.0  ;;  %v1216_v1 = vmul.f32 0.1, %v1152_v60  ;;  %v1011_v3 = vadd.f32 %v2783_v23, %v2054_v61  ;;  %v2057_v4 = vadd.f32 %v2056_v0, %v2055_v62 }
 0x12e   : > { %v1247_v10 = vsel %vm1183_vm9, %v1151_v55, %v1215_v30 }
 0x12f   : > { %v1114_v6 = vmul.f32 %v2775_v17, %v1011_v3  ;;  %v1014_v7 = vadd.f32 %v2789_v28, %v2057_v4  ;;  %v1248_v12 = vsel %vm1184_vm10, %v1152_v60, %v1216_v1 }
 0x130   : > { %v1275_v14 = vpack.c.bf16 %v1248_v12, %v1247_v10 }
 0x131   : > { %v1153_v16 = vadd.f32 %v2780_v20, %v1114_v6  ;;  %v1115_v18 = vmul.f32 %v2775_v17, %v1014_v7  ;;  %v2058_v19 = vpop.f32.mrb[24].mxu0 }
 0x132   : > { %v2059_v23 = vpop.f32.mrb[25].mxu0  ;;  %2202 = vmatprep.mubr.msk.bf16.mxu1 %vm726_vm0, %v1275_v14 }
 0x133   : > { %v1217_v28 = vmul.f32 0.1, %v1153_v16  ;;  %v1154_v25 = vadd.f32 %v2780_v20, %v1115_v18  ;;  %v2060_v26 = vadd.f32 %v2059_v23, %v2058_v19  ;;  %v2061_v29 = vpop.f32.mrb[26].mxu0  ;;  %vm1185_vm11 = vcmp.gt.f32.partialorder %v1153_v16, 0.0 }
 0x134   : > { %v2062_v32 = vpop.f32.mrb[27].mxu0 }
 0x135   : > { %v1218_v33 = vmul.f32 0.1, %v1154_v25  ;;  %v2063_v34 = vadd.f32 %v2062_v32, %v2061_v29  ;;  %v1019_v8 = vadd.f32 %v2060_v26, %v2797_v45  ;;  %vm1186_vm12 = vcmp.gt.f32.partialorder %v1154_v25, 0.0 }
 0x136   : > { %v1249_v38 = vsel %vm1185_vm11, %v1153_v16, %v1217_v28 }
 0x137   : > { %v1116_v11 = vmul.f32 %v2775_v17, %v1019_v8  ;;  %v1022_v37 = vadd.f32 %v2063_v34, %v2804_v51  ;;  %v1250_v39 = vsel %vm1186_vm12, %v1154_v25, %v1218_v33 }
 0x138   : > { %v1276_v40 = vpack.c.bf16 %v1250_v39, %v1249_v38 }
 0x139   : > { %v1155_v41 = vadd.f32 %v2780_v20, %v1116_v11  ;;  %v1117_v42 = vmul.f32 %v2775_v17, %v1022_v37  ;;  %v2064_v44 = vpop.f32.mrb[28].mxu0 }
 0x13a   : > { %v2065_v46 = vpop.f32.mrb[29].mxu0  ;;  %2203 = vmatmul.mubr.msk.bf16.gmra.mrb[40].mxu1 %vm726_vm0, %v1276_v40 }
 0x13b   : > { %v1219_v47 = vmul.f32 0.1, %v1155_v41  ;;  %v1156_v48 = vadd.f32 %v2780_v20, %v1117_v42  ;;  %v2066_v45 = vadd.f32 %v2065_v46, %v2064_v44  ;;  %v2067_v50 = vpop.f32.mrb[30].mxu0  ;;  %vm1187_vm13 = vcmp.gt.f32.partialorder %v1155_v41, 0.0 }
 0x13c   : > { %v2068_v53 = vpop.f32.mrb[31].mxu0 }
 0x13d   : > { %vm1188_vm14 = vcmp.gt.f32.partialorder %v1156_v48, 0.0  ;;  %v1220_v51 = vmul.f32 0.1, %v1156_v48  ;;  %v1027_v55 = vadd.f32 %v2795_v43, %v2066_v45  ;;  %v2069_v56 = vadd.f32 %v2068_v53, %v2067_v50 }
 0x13e   : > { %v1251_v30 = vsel %vm1187_vm13, %v1155_v41, %v1219_v47 }
 0x13f   : > { %v1118_v57 = vmul.f32 %v2775_v17, %v1027_v55  ;;  %v1030_v24 = vadd.f32 %v2801_v49, %v2069_v56  ;;  %v1252_v60 = vsel %vm1188_vm14, %v1156_v48, %v1220_v51 }
 0x140   : > { %v1277_v61 = vpack.c.bf16 %v1252_v60, %v1251_v30 }
 0x141   : > { %v1157_v62 = vadd.f32 %v2780_v20, %v1118_v57  ;;  %v1119_v0 = vmul.f32 %v2775_v17, %v1030_v24  ;;  %v2070_v1 = vpop.f32.mrb[32].mxu0 }
 0x142   : > { %v2071_v3 = vpop.f32.mrb[33].mxu0  ;;  %2206 = vmatprep.mubr.msk.bf16.mxu1 %vm726_vm0, %v1277_v61 }
 0x143   : > { %v1221_v4 = vmul.f32 0.1, %v1157_v62  ;;  %v1158_v6 = vadd.f32 %v2780_v20, %v1119_v0  ;;  %v2072_v43 = vadd.f32 %v2071_v3, %v2070_v1  ;;  %v2073_v7 = vpop.f32.mrb[34].mxu0  ;;  %vm1189_vm15 = vcmp.gt.f32.partialorder %v1157_v62, 0.0 }
 0x144   : > { %v2074_v10 = vpop.f32.mrb[35].mxu0 }
 0x145   : > { %v1222_v12 = vmul.f32 0.1, %v1158_v6  ;;  %v2075_v49 = vadd.f32 %v2074_v10, %v2073_v7  ;;  %v1035_v14 = vadd.f32 %v2072_v43, %v2810_v2  ;;  %vm1190_vm1 = vcmp.gt.f32.partialorder %v1158_v6, 0.0 }
 0x146   : > { %v1253_v19 = vsel %vm1189_vm15, %v1157_v62, %v1221_v4 }
 0x147   : > { %v1120_v16 = vmul.f32 %v2775_v17, %v1035_v14  ;;  %v1038_v18 = vadd.f32 %v2075_v49, %v2817_v9  ;;  %v1254_v23 = vsel %vm1190_vm1, %v1158_v6, %v1222_v12 }
 0x148   : > { %v1278_v28 = vpack.c.bf16 %v1254_v23, %v1253_v19 }
 0x149   : > { %v1159_v25 = vadd.f32 %v2780_v20, %v1120_v16  ;;  %v1121_v26 = vmul.f32 %v2775_v17, %v1038_v18  ;;  %v2076_v29 = vpop.f32.mrb[36].mxu0 }
 0x14a   : > { %v2077_v32 = vpop.f32.mrb[37].mxu0  ;;  %2207 = vmatmul.mubr.msk.bf16.gmra.mrb[44].mxu1 %vm726_vm0, %v1278_v28 }
 0x14b   : > { %v1223_v33 = vmul.f32 0.1, %v1159_v25  ;;  %v1160_v34 = vadd.f32 %v2780_v20, %v1121_v26  ;;  %v2078_v2 = vadd.f32 %v2077_v32, %v2076_v29  ;;  %v2079_v8 = vpop.f32.mrb[38].mxu0  ;;  %vm1191_vm2 = vcmp.gt.f32.partialorder %v1159_v25, 0.0 }
 0x14c   : > { %v2080_v11 = vpop.f32.mrb[39].mxu0 }
 0x14d   : > { %vm1192_vm3 = vcmp.gt.f32.partialorder %v1160_v34, 0.0  ;;  %v1224_v9 = vmul.f32 0.1, %v1160_v34  ;;  %v1043_v37 = vadd.f32 %v2807_v63, %v2078_v2  ;;  %v2081_v38 = vadd.f32 %v2080_v11, %v2079_v8 }
 0x14e   : > { %v1255_v41 = vsel %vm1191_vm2, %v1159_v25, %v1223_v33 }
 0x14f   : > { %v1122_v39 = vmul.f32 %v2775_v17, %v1043_v37  ;;  %v1046_v40 = vadd.f32 %v2813_v5, %v2081_v38  ;;  %v1256_v42 = vsel %vm1192_vm3, %v1160_v34, %v1224_v9 }
 0x150   : > { %v1279_v44 = vpack.c.bf16 %v1256_v42, %v1255_v41 }
 0x151   : > { %v1161_v46 = vadd.f32 %v2780_v20, %v1122_v39  ;;  %v1123_v47 = vmul.f32 %v2775_v17, %v1046_v40  ;;  %v2082_v48 = vpop.f32.mrb[40].mxu0 }
 0x152   : > { %v2083_v45 = vpop.f32.mrb[41].mxu0  ;;  %2210 = vmatprep.mubr.msk.bf16.mxu1 %vm726_vm0, %v1279_v44 }
 0x153   : > { %v1225_v50 = vmul.f32 0.1, %v1161_v46  ;;  %v1162_v53 = vadd.f32 %v2780_v20, %v1123_v47  ;;  %v2084_v63 = vadd.f32 %v2083_v45, %v2082_v48  ;;  %v2085_v51 = vpop.f32.mrb[42].mxu0  ;;  %vm1193_vm4 = vcmp.gt.f32.partialorder %v1161_v46, 0.0 }
 0x154   : > { %v2086_v55 = vpop.f32.mrb[43].mxu0 }
 0x155   : > { %v1226_v56 = vmul.f32 0.1, %v1162_v53  ;;  %v2087_v5 = vadd.f32 %v2086_v55, %v2085_v51  ;;  %v1051_v57 = vadd.f32 %v2084_v63, %v2825_v31  ;;  %vm1194_vm5 = vcmp.gt.f32.partialorder %v1162_v53, 0.0 }
 0x156   : > { %v1257_v60 = vsel %vm1193_vm4, %v1161_v46, %v1225_v50 }
 0x157   : > { %v1124_v24 = vmul.f32 %v2775_v17, %v1051_v57  ;;  %v1054_v30 = vadd.f32 %v2087_v5, %v2832_v36  ;;  %v1258_v61 = vsel %vm1194_vm5, %v1162_v53, %v1226_v56 }
 0x158   : > { %v1280_v62 = vpack.c.bf16 %v1258_v61, %v1257_v60 }
 0x159   : > { %v1163_v0 = vadd.f32 %v2780_v20, %v1124_v24  ;;  %v1125_v1 = vmul.f32 %v2775_v17, %v1054_v30  ;;  %v2088_v3 = vpop.f32.mrb[44].mxu0 }
 0x15a   : > { %v2089_v4 = vpop.f32.mrb[45].mxu0  ;;  %2211 = vmatmul.mubr.msk.bf16.gmra.mrb[48].mxu1 %vm726_vm0, %v1280_v62 }
 0x15b   : > { %v1227_v6 = vmul.f32 0.1, %v1163_v0  ;;  %v1164_v43 = vadd.f32 %v2780_v20, %v1125_v1  ;;  %v2090_v31 = vadd.f32 %v2089_v4, %v2088_v3  ;;  %v2091_v7 = vpop.f32.mrb[46].mxu0  ;;  %vm1195_vm6 = vcmp.gt.f32.partialorder %v1163_v0, 0.0 }
 0x15c   : > { %v2092_v10 = vpop.f32.mrb[47].mxu0 }
 0x15d   : > { %vm1196_vm7 = vcmp.gt.f32.partialorder %v1164_v43, 0.0  ;;  %v1228_v36 = vmul.f32 0.1, %v1164_v43  ;;  %v1059_v12 = vadd.f32 %v2823_v27, %v2090_v31  ;;  %v2093_v49 = vadd.f32 %v2092_v10, %v2091_v7 }
 0x15e   : > { %v1259_v18 = vsel %vm1195_vm6, %v1163_v0, %v1227_v6 }
 0x15f   : > { %v1126_v14 = vmul.f32 %v2775_v17, %v1059_v12  ;;  %v1062_v16 = vadd.f32 %v2829_v35, %v2093_v49  ;;  %v1260_v19 = vsel %vm1196_vm7, %v1164_v43, %v1228_v36 }
 0x160   : > { %v1281_v23 = vpack.c.bf16 %v1260_v19, %v1259_v18 }
 0x161   : > { %v1165_v28 = vadd.f32 %v2780_v20, %v1126_v14  ;;  %v1127_v25 = vmul.f32 %v2775_v17, %v1062_v16  ;;  %v2094_v26 = vpop.f32.mrb[48].mxu0 }
 0x162   : > { %v2095_v29 = vpop.f32.mrb[49].mxu0  ;;  %2214 = vmatprep.mubr.msk.bf16.mxu1 %vm726_vm0, %v1281_v23 }
 0x163   : > { %v1229_v32 = vmul.f32 0.1, %v1165_v28  ;;  %v1166_v33 = vadd.f32 %v2780_v20, %v1127_v25  ;;  %v2096_v27 = vadd.f32 %v2095_v29, %v2094_v26  ;;  %v2097_v34 = vpop.f32.mrb[50].mxu0  ;;  %vm1197_vm8 = vcmp.gt.f32.partialorder %v1165_v28, 0.0 }
 0x164   : > { %v2098_v2 = vpop.f32.mrb[51].mxu0 }
 0x165   : > { %v1230_v8 = vmul.f32 0.1, %v1166_v33  ;;  %v2099_v35 = vadd.f32 %v2098_v2, %v2097_v34  ;;  %v1067_v11 = vadd.f32 %v2096_v27, %v2840_v54  ;;  %vm1198_vm9 = vcmp.gt.f32.partialorder %v1166_v33, 0.0 }
 0x166   : > { %v1261_v38 = vsel %vm1197_vm8, %v1165_v28, %v1229_v32 }
 0x167   : > { %v1128_v9 = vmul.f32 %v2775_v17, %v1067_v11  ;;  %v1070_v37 = vadd.f32 %v2099_v35, %v2847_v59  ;;  %v1262_v39 = vsel %vm1198_vm9, %v1166_v33, %v1230_v8 }
 0x168   : > { %v1282_v40 = vpack.c.bf16 %v1262_v39, %v1261_v38 }
 0x169   : > { %v1167_v41 = vadd.f32 %v2780_v20, %v1128_v9  ;;  %v1129_v42 = vmul.f32 %v2775_v17, %v1070_v37  ;;  %v2100_v44 = vpop.f32.mrb[52].mxu0 }
 0x16a   : > { %v2101_v46 = vpop.f32.mrb[53].mxu0  ;;  %2215 = vmatmul.mubr.msk.bf16.gmra.mrb[52].mxu1 %vm726_vm0, %v1282_v40 }
 0x16b   : > { %v1231_v47 = vmul.f32 0.1, %v1167_v41  ;;  %v1168_v48 = vadd.f32 %v2780_v20, %v1129_v42  ;;  %v2102_v54 = vadd.f32 %v2101_v46, %v2100_v44  ;;  %v2103_v45 = vpop.f32.mrb[54].mxu0  ;;  %vm1199_vm10 = vcmp.gt.f32.partialorder %v1167_v41, 0.0 }
 0x16c   : > { %v2104_v50 = vpop.f32.mrb[55].mxu0 }
 0x16d   : > { %vm1200_vm11 = vcmp.gt.f32.partialorder %v1168_v48, 0.0  ;;  %v1232_v59 = vmul.f32 0.1, %v1168_v48  ;;  %v1075_v53 = vadd.f32 %v2838_v52, %v2102_v54  ;;  %v2105_v63 = vadd.f32 %v2104_v50, %v2103_v45 }
 0x16e   : > { %v1263_v56 = vsel %vm1199_vm10, %v1167_v41, %v1231_v47  ;;  %v1714_v50 = vlaneseq }
 0x16f   : > { %v1130_v51 = vmul.f32 %v2775_v17, %v1075_v53  ;;  %v1078_v55 = vadd.f32 %v2844_v58, %v2105_v63  ;;  %v1264_v5 = vsel %vm1200_vm11, %v1168_v48, %v1232_v59  ;;  %v1519_v59 = vld [vmem:[%s3234_s6] sm:$0x1] }
 0x170   : > { %v1283_v57 = vpack.c.bf16 %v1264_v5, %v1263_v56  ;;  %v1715_v53 = vshrl.u32 %v1714_v50, 7 }
 0x171   : > { %v1169_v24 = vadd.f32 %v2780_v20, %v1130_v51  ;;  %v1131_v30 = vmul.f32 %v2775_v17, %v1078_v55  ;;  %v2106_v60 = vpop.f32.mrb[56].mxu0 }
 0x172   : > { %v2107_v61 = vpop.f32.mrb[57].mxu0  ;;  %2218 = vmatprep.mubr.msk.bf16.mxu1 %vm726_vm0, %v1283_v57  ;;  %v2545_v57 = vmov 0  }
 0x173   : > { %v1233_v62 = vmul.f32 0.1, %v1169_v24  ;;  %v1170_v0 = vadd.f32 %v2780_v20, %v1131_v30  ;;  %v2108_v52 = vadd.f32 %v2107_v61, %v2106_v60  ;;  %v2109_v1 = vpop.f32.mrb[58].mxu0  ;;  %vm1201_vm12 = vcmp.gt.f32.partialorder %v1169_v24, 0.0 }
 0x174   : > { %v2110_v3 = vpop.f32.mrb[59].mxu0 }
 0x175   : > { %v1234_v4 = vmul.f32 0.1, %v1170_v0  ;;  %v2111_v58 = vadd.f32 %v2110_v3, %v2109_v1  ;;  %v1083_v6 = vadd.f32 %v2108_v52, %v2855_v15  ;;  %vm1202_vm13 = vcmp.gt.f32.partialorder %v1170_v0, 0.0 }
 0x176   : > { %v1265_v7 = vsel %vm1201_vm12, %v1169_v24, %v1233_v62 }
 0x177   : > { %v1132_v43 = vmul.f32 %v2775_v17, %v1083_v6  ;;  %v1086_v31 = vadd.f32 %v2111_v58, %v2862_v22  ;;  %v1266_v10 = vsel %vm1202_vm13, %v1170_v0, %v1234_v4  ;;  %v1716_v0 = vsub.s32 0, %v1715_v53 }
 0x178   : > { %v1284_v36 = vpack.c.bf16 %v1266_v10, %v1265_v7 }
 0x179   : > { %v1171_v12 = vadd.f32 %v2780_v20, %v1132_v43  ;;  %v1133_v49 = vmul.f32 %v2775_v17, %v1086_v31  ;;  %v2112_v14 = vpop.f32.mrb[60].mxu0 }
 0x17a   : > { %v2113_v16 = vpop.f32.mrb[61].mxu0  ;;  %2219 = vmatmul.mubr.msk.bf16.gmra.mrb[56].mxu1 %vm726_vm0, %v1284_v36 }
 0x17b   : > { %v1235_v18 = vmul.f32 0.1, %v1171_v12  ;;  %v1172_v19 = vadd.f32 %v2780_v20, %v1133_v49  ;;  %v2114_v15 = vadd.f32 %v2113_v16, %v2112_v14  ;;  %v2115_v23 = vpop.f32.mrb[62].mxu0  ;;  %vm1203_vm14 = vcmp.gt.f32.partialorder %v1171_v12, 0.0 }
 0x17c   : > { %v2116_v28 = vpop.f32.mrb[63].mxu0 }
 0x17d   : > { %vm1204_vm15 = vcmp.gt.f32.partialorder %v1172_v19, 0.0  ;;  %v1236_v22 = vmul.f32 0.1, %v1172_v19  ;;  %v1091_v25 = vadd.f32 %v2853_v13, %v2114_v15  ;;  %v2117_v26 = vadd.f32 %v2116_v28, %v2115_v23 }
 0x17e   : > { %v1267_v33 = vsel %vm1203_vm14, %v1171_v12, %v1235_v18 }
 0x17f   : > { %v1134_v29 = vmul.f32 %v2775_v17, %v1091_v25  ;;  %v1094_v32 = vadd.f32 %v2859_v21, %v2117_v26  ;;  %v1268_v27 = vsel %vm1204_vm15, %v1172_v19, %v1236_v22  ;;  %v2939_v21 = vld [vmem:[%s3233_s5] ss:$0 sm:$0xff] }
 0x180   : > { %v1285_v34 = vpack.c.bf16 %v1268_v27, %v1267_v33 }
 0x181   : > { %v1173_v2 = vadd.f32 %v2780_v20, %v1134_v29  ;;  %v1135_v8 = vmul.f32 %v2775_v17, %v1094_v32 }
 0x182   : > { %2222 = vmatprep.mubr.msk.bf16.mxu1 %vm726_vm0, %v1285_v34 }
 0x183   : > { %v1237_v35 = vmul.f32 0.1, %v1173_v2  ;;  %v1174_v11 = vadd.f32 %v2780_v20, %v1135_v8  ;;  %vm1205_vm1 = vcmp.gt.f32.partialorder %v1173_v2, 0.0 }
 0x185   : > { %v1238_v9 = vmul.f32 0.1, %v1174_v11  ;;  %vm1206_vm2 = vcmp.gt.f32.partialorder %v1174_v11, 0.0  ;;  %v1269_v13 = vsel %vm1205_vm1, %v1173_v2, %v1237_v35 }
 0x187   : > { %v1270_v37 = vsel %vm1206_vm2, %v1174_v11, %v1238_v9 }
 0x188   : > { %v1286_v38 = vpack.c.bf16 %v1270_v37, %v1269_v13 }
 0x18a   : > { %2223 = vmatmul.mubr.msk.bf16.gmra.mrb[60].mxu1 %vm726_vm0, %v1286_v38  ;;  %vm1520_vm0 = vcmp.gt.f32.partialorder %v1519_v59, 0.5 }
 0x18b   : > { %v1713_v24 = vsel %vm1520_vm0, 1, %v2545_v57 }
 0x18c   : > { %v2964_v36 = vrot.slane %v1713_v24, %v1716_v0 }
 0x18e   : > { %vm1718_vm3 = vcmp.eq.s32.totalorder %v2964_v36, 1 }
 0x1ed   : > { %v2196_v39 = vpop.f32.mrb[32].mxu1 }
 0x1ee   : > { %v1401_v17 = vadd.f32 %v2196_v39, %v2939_v21  ;;  %v1392_v40 = vpop.f32.mrb[33].mxu1 }
 0x1ef   : > { %v1393_v41 = vadd.f32 %v2939_v21, %v1392_v40  ;;  %v2197_v20 = vpop.f32.mrb[34].mxu1 }
 0x1f0   : > { %v1970_v42 = vmul.f32 -1.442695, %v1401_v17  ;;  %v1404_v44 = vadd.f32 %v2197_v20, %v2939_v21  ;;  %v1395_v46 = vpop.f32.mrb[35].mxu1 }
 0x1f1   : > { %v1968_v47 = vmul.f32 -1.442695, %v1393_v41  ;;  %v1396_v48 = vadd.f32 %v2939_v21, %v1395_v46 }
 0x1f2   : > { %2353 = vpow2.f32 %v1970_v42  ;;  %v1971_v54 = vmul.f32 -1.442695, %v1404_v44 }
 0x1f3   : > { %2355 = vpow2.f32 %v1968_v47  ;;  %v1969_v45 = vmul.f32 -1.442695, %v1396_v48 }
 0x1f4   : > { %2357 = vpow2.f32 %v1971_v54 }
 0x1f5   : > { %2359 = vpow2.f32 %v1969_v45 }
 0x1fc   : > { %v2354_v63 = vpop.eup %2353 }
 0x1fd   : > { %v2356_v51 = vpop.eup %2355  ;;  %v1619_v55 = vadd.f32 1.0, %v2354_v63  ;;  %v2200_v56 = vpop.f32.mrb[36].mxu1 }
 0x1fe   : > { %v2358_v5 = vpop.eup %2357  ;;  %v1617_v30 = vadd.f32 1.0, %v2356_v51  ;;  %v2949_v60 = vadd.f32 %v2200_v56, %v2939_v21  ;;  %v1408_v61 = vpop.f32.mrb[37].mxu1 }
 0x1ff   : > { %v2360_v62 = vpop.eup %2359  ;;  %2361 = vrcp.f32 %v1619_v55  ;;  %v1620_v52 = vadd.f32 1.0, %v2358_v5  ;;  %v2952_v1 = vadd.f32 %v2939_v21, %v1408_v61  ;;  %v2201_v3 = vpop.f32.mrb[38].mxu1 }
 0x200   : > { %2363 = vrcp.f32 %v1617_v30  ;;  %v1618_v4 = vadd.f32 1.0, %v2360_v62  ;;  %v1974_v58 = vmul.f32 -1.442695, %v2949_v60  ;;  %v2956_v6 = vadd.f32 %v2201_v3, %v2939_v21  ;;  %v1411_v43 = vpop.f32.mrb[39].mxu1 }
 0x201   : > { %2365 = vrcp.f32 %v1620_v52  ;;  %v1972_v31 = vmul.f32 -1.442695, %v2952_v1  ;;  %v2960_v7 = vadd.f32 %v2939_v21, %v1411_v43 }
 0x202   : > { %2367 = vrcp.f32 %v1618_v4  ;;  %v1975_v10 = vmul.f32 -1.442695, %v2956_v6 }
 0x203   : > { %2369 = vpow2.f32 %v1974_v58  ;;  %v1973_v12 = vmul.f32 -1.442695, %v2960_v7 }
 0x204   : > { %2371 = vpow2.f32 %v1972_v31 }
 0x205   : > { %2373 = vpow2.f32 %v1975_v10 }
 0x206   : > { %2375 = vpow2.f32 %v1973_v12 }
 0x209   : > { %v2362_v49 = vpop.eup %2361 }
 0x20a   : > { %v2364_v14 = vpop.eup %2363  ;;  %v1721_v16 = vsel %vm1718_vm3, %v2362_v49, %v1401_v17 }
 0x20b   : > { %v2366_v18 = vpop.eup %2365  ;;  %1753 = vst [vmem:[%s2972_s9 + $0x10] sm:$0xff] %v1721_v16  ;;  %v1719_v19 = vsel %vm1718_vm3, %v2364_v14, %v1393_v41 }
 0x20c   : > { %v2368_v15 = vpop.eup %2367  ;;  %1751 = vst [vmem:[%s2972_s9] sm:$0xff] %v1719_v19  ;;  %v1722_v23 = vsel %vm1718_vm3, %v2366_v18, %v1404_v44 }
 0x20d   : > { %v2370_v28 = vpop.eup %2369  ;;  %1754 = vst [vmem:[%s2972_s9 + $0x18] sm:$0xff] %v1722_v23  ;;  %v1720_v22 = vsel %vm1718_vm3, %v2368_v15, %v1396_v48  ;;  %v2204_v25 = vpop.f32.mrb[40].mxu1 }
 0x20e   : > { %v2372_v26 = vpop.eup %2371  ;;  %1752 = vst [vmem:[%s2972_s9 + $0x8] sm:$0xff] %v1720_v22  ;;  %v1623_v29 = vadd.f32 1.0, %v2370_v28  ;;  %v2985_v32 = vadd.f32 %v2204_v25, %v2939_v21  ;;  %v1424_v33 = vpop.f32.mrb[41].mxu1 }
 0x20f   : > { %v2374_v27 = vpop.eup %2373  ;;  %v1621_v34 = vadd.f32 1.0, %v2372_v26  ;;  %v2988_v2 = vadd.f32 %v2939_v21, %v1424_v33  ;;  %v2205_v8 = vpop.f32.mrb[42].mxu1 }
 0x210   : > { %v2376_v35 = vpop.eup %2375  ;;  %2377 = vrcp.f32 %v1623_v29  ;;  %v1624_v11 = vadd.f32 1.0, %v2374_v27  ;;  %v1978_v9 = vmul.f32 -1.442695, %v2985_v32  ;;  %v2992_v13 = vadd.f32 %v2205_v8, %v2939_v21  ;;  %v1427_v37 = vpop.f32.mrb[43].mxu1 }
 0x211   : > { %2379 = vrcp.f32 %v1621_v34  ;;  %v1622_v38 = vadd.f32 1.0, %v2376_v35  ;;  %v1976_v39 = vmul.f32 -1.442695, %v2988_v2  ;;  %v2996_v17 = vadd.f32 %v2939_v21, %v1427_v37 }
 0x212   : > { %2381 = vrcp.f32 %v1624_v11  ;;  %v1979_v40 = vmul.f32 -1.442695, %v2992_v13 }
 0x213   : > { %2383 = vrcp.f32 %v1622_v38  ;;  %v1977_v41 = vmul.f32 -1.442695, %v2996_v17 }
 0x214   : > { %2385 = vpow2.f32 %v1978_v9 }
 0x215   : > { %2387 = vpow2.f32 %v1976_v39 }
 0x216   : > { %2389 = vpow2.f32 %v1979_v40 }
 0x217   : > { %2391 = vpow2.f32 %v1977_v41 }
 0x21a   : > { %v2378_v20 = vpop.eup %2377 }
 0x21b   : > { %v2380_v42 = vpop.eup %2379  ;;  %v1725_v44 = vsel %vm1718_vm3, %v2378_v20, %v2949_v60 }
 0x21c   : > { %v2382_v46 = vpop.eup %2381  ;;  %1757 = vst [vmem:[%s2972_s9 + $0x30] sm:$0xff] %v1725_v44  ;;  %v1723_v47 = vsel %vm1718_vm3, %v2380_v42, %v2952_v1 }
 0x21d   : > { %v2384_v48 = vpop.eup %2383  ;;  %1755 = vst [vmem:[%s2972_s9 + $0x20] sm:$0xff] %v1723_v47  ;;  %v1726_v54 = vsel %vm1718_vm3, %v2382_v46, %v2956_v6  ;;  %v2208_v45 = vpop.f32.mrb[44].mxu1 }
 0x21e   : > { %v2386_v50 = vpop.eup %2385  ;;  %1758 = vst [vmem:[%s2972_s9 + $0x38] sm:$0xff] %v1726_v54  ;;  %v1724_v59 = vsel %vm1718_vm3, %v2384_v48, %v2960_v7  ;;  %v3016_v53 = vadd.f32 %v2208_v45, %v2939_v21  ;;  %v1440_v63 = vpop.f32.mrb[45].mxu1 }
 0x21f   : > { %v2388_v51 = vpop.eup %2387  ;;  %1756 = vst [vmem:[%s2972_s9 + $0x28] sm:$0xff] %v1724_v59  ;;  %v1627_v55 = vadd.f32 1.0, %v2386_v50  ;;  %v3020_v56 = vadd.f32 %v2939_v21, %v1440_v63  ;;  %v2209_v5 = vpop.f32.mrb[46].mxu1 }
 0x220   : > { %v2390_v57 = vpop.eup %2389  ;;  %v1625_v24 = vadd.f32 1.0, %v2388_v51  ;;  %v3023_v30 = vadd.f32 %v2209_v5, %v2939_v21  ;;  %v1443_v60 = vpop.f32.mrb[47].mxu1  ;;  %v1982_v0 = vmul.f32 -1.442695, %v3016_v53 }
 0x221   : > { %v2392_v61 = vpop.eup %2391  ;;  %2393 = vrcp.f32 %v1627_v55  ;;  %v1628_v62 = vadd.f32 1.0, %v2390_v57  ;;  %v3027_v52 = vadd.f32 %v2939_v21, %v1443_v60  ;;  %v1980_v3 = vmul.f32 -1.442695, %v3020_v56 }
 0x222   : > { %2395 = vrcp.f32 %v1625_v24  ;;  %v1626_v1 = vadd.f32 1.0, %v2392_v61  ;;  %v1983_v4 = vmul.f32 -1.442695, %v3023_v30 }
 0x223   : > { %2397 = vrcp.f32 %v1628_v62  ;;  %v1981_v58 = vmul.f32 -1.442695, %v3027_v52 }
 0x224   : > { %2399 = vrcp.f32 %v1626_v1 }
 0x225   : > { %2401 = vpow2.f32 %v1982_v0 }
 0x226   : > { %2403 = vpow2.f32 %v1980_v3 }
 0x227   : > { %2405 = vpow2.f32 %v1983_v4 }
 0x228   : > { %2407 = vpow2.f32 %v1981_v58 }
 0x22b   : > { %v2394_v6 = vpop.eup %2393 }
 0x22c   : > { %v2396_v43 = vpop.eup %2395  ;;  %v1729_v31 = vsel %vm1718_vm3, %v2394_v6, %v2985_v32 }
 0x22d   : > { %v2398_v7 = vpop.eup %2397  ;;  %1761 = vst [vmem:[%s2972_s9 + $0x50] sm:$0xff] %v1729_v31  ;;  %v1727_v10 = vsel %vm1718_vm3, %v2396_v43, %v2988_v2  ;;  %v2212_v12 = vpop.f32.mrb[48].mxu1 }
 0x22e   : > { %v2400_v49 = vpop.eup %2399  ;;  %1759 = vst [vmem:[%s2972_s9 + $0x40] sm:$0xff] %v1727_v10  ;;  %v1730_v14 = vsel %vm1718_vm3, %v2398_v7, %v2992_v13  ;;  %v3044_v16 = vadd.f32 %v2212_v12, %v2939_v21  ;;  %v1456_v18 = vpop.f32.mrb[49].mxu1 }
 0x22f   : > { %v2402_v19 = vpop.eup %2401  ;;  %1762 = vst [vmem:[%s2972_s9 + $0x58] sm:$0xff] %v1730_v14  ;;  %v1728_v15 = vsel %vm1718_vm3, %v2400_v49, %v2996_v17  ;;  %v3051_v23 = vadd.f32 %v2939_v21, %v1456_v18  ;;  %v2213_v28 = vpop.f32.mrb[50].mxu1 }
 0x230   : > { %v2404_v22 = vpop.eup %2403  ;;  %1760 = vst [vmem:[%s2972_s9 + $0x48] sm:$0xff] %v1728_v15  ;;  %v1631_v25 = vadd.f32 1.0, %v2402_v19  ;;  %v3055_v26 = vadd.f32 %v2213_v28, %v2939_v21  ;;  %v1459_v29 = vpop.f32.mrb[51].mxu1  ;;  %v1986_v8 = vmul.f32 -1.442695, %v3044_v16 }
 0x231   : > { %v2406_v32 = vpop.eup %2405  ;;  %v1629_v33 = vadd.f32 1.0, %v2404_v22  ;;  %v3058_v27 = vadd.f32 %v2939_v21, %v1459_v29  ;;  %v1984_v11 = vmul.f32 -1.442695, %v3051_v23 }
 0x232   : > { %v2408_v34 = vpop.eup %2407  ;;  %2409 = vrcp.f32 %v1631_v25  ;;  %v1632_v2 = vadd.f32 1.0, %v2406_v32  ;;  %v1987_v9 = vmul.f32 -1.442695, %v3055_v26 }
 0x233   : > { %2411 = vrcp.f32 %v1629_v33  ;;  %v1630_v35 = vadd.f32 1.0, %v2408_v34  ;;  %v1985_v13 = vmul.f32 -1.442695, %v3058_v27 }
 0x234   : > { %2413 = vrcp.f32 %v1632_v2 }
 0x235   : > { %2415 = vrcp.f32 %v1630_v35 }
 0x236   : > { %2417 = vpow2.f32 %v1986_v8 }
 0x237   : > { %2419 = vpow2.f32 %v1984_v11 }
 0x238   : > { %2421 = vpow2.f32 %v1987_v9 }
 0x239   : > { %2423 = vpow2.f32 %v1985_v13 }
 0x23c   : > { %v2410_v37 = vpop.eup %2409 }
 0x23d   : > { %v2412_v38 = vpop.eup %2411  ;;  %v1733_v39 = vsel %vm1718_vm3, %v2410_v37, %v3016_v53  ;;  %v2216_v17 = vpop.f32.mrb[52].mxu1 }
 0x23e   : > { %v2414_v40 = vpop.eup %2413  ;;  %1765 = vst [vmem:[%s2972_s9 + $0x70] sm:$0xff] %v1733_v39  ;;  %v1731_v41 = vsel %vm1718_vm3, %v2412_v38, %v3020_v56  ;;  %v3072_v20 = vadd.f32 %v2216_v17, %v2939_v21  ;;  %v1472_v42 = vpop.f32.mrb[53].mxu1 }
 0x23f   : > { %v2416_v44 = vpop.eup %2415  ;;  %1763 = vst [vmem:[%s2972_s9 + $0x60] sm:$0xff] %v1731_v41  ;;  %v1734_v46 = vsel %vm1718_vm3, %v2414_v40, %v3023_v30  ;;  %v3079_v47 = vadd.f32 %v2939_v21, %v1472_v42  ;;  %v2217_v48 = vpop.f32.mrb[54].mxu1 }
 0x240   : > { %v2418_v54 = vpop.eup %2417  ;;  %1766 = vst [vmem:[%s2972_s9 + $0x78] sm:$0xff] %v1734_v46  ;;  %v1732_v45 = vsel %vm1718_vm3, %v2416_v44, %v3027_v52  ;;  %v1990_v50 = vmul.f32 -1.442695, %v3072_v20  ;;  %v3087_v59 = vadd.f32 %v2217_v48, %v2939_v21  ;;  %v1475_v53 = vpop.f32.mrb[55].mxu1 }
 0x241   : > { %v2420_v63 = vpop.eup %2419  ;;  %1764 = vst [vmem:[%s2972_s9 + $0x68] sm:$0xff] %v1732_v45  ;;  %v1635_v51 = vadd.f32 1.0, %v2418_v54  ;;  %v3091_v55 = vadd.f32 %v2939_v21, %v1475_v53  ;;  %v1988_v30 = vmul.f32 -1.442695, %v3079_v47 }
 0x242   : > { %v2422_v56 = vpop.eup %2421  ;;  %v1633_v5 = vadd.f32 1.0, %v2420_v63  ;;  %2425 = vpow2.f32 %v1990_v50  ;;  %v1991_v61 = vmul.f32 -1.442695, %v3087_v59 }
 0x243   : > { %v2424_v57 = vpop.eup %2423  ;;  %2427 = vrcp.f32 %v1635_v51  ;;  %v1636_v24 = vadd.f32 1.0, %v2422_v56  ;;  %v1989_v62 = vmul.f32 -1.442695, %v3091_v55 }
 0x244   : > { %2429 = vrcp.f32 %v1633_v5  ;;  %v1634_v60 = vadd.f32 1.0, %v2424_v57 }
 0x245   : > { %2431 = vrcp.f32 %v1636_v24 }
 0x246   : > { %2433 = vrcp.f32 %v1634_v60 }
 0x247   : > { %2435 = vpow2.f32 %v1988_v30 }
 0x248   : > { %2437 = vpow2.f32 %v1991_v61 }
 0x249   : > { %2439 = vpow2.f32 %v1989_v62 }
 0x24c   : > { %v2426_v0 = vpop.eup %2425 }
 0x24d   : > { %v2428_v52 = vpop.eup %2427  ;;  %v1639_v1 = vadd.f32 1.0, %v2426_v0  ;;  %v2220_v3 = vpop.f32.mrb[56].mxu1 }
 0x24e   : > { %v2430_v4 = vpop.eup %2429  ;;  %v1737_v58 = vsel %vm1718_vm3, %v2428_v52, %v3044_v16  ;;  %v3100_v6 = vadd.f32 %v2220_v3, %v2939_v21  ;;  %v1488_v43 = vpop.f32.mrb[57].mxu1 }
 0x24f   : > { %v2432_v31 = vpop.eup %2431  ;;  %1769 = vst [vmem:[%s2972_s9 + $0x90] sm:$0xff] %v1737_v58  ;;  %v1735_v7 = vsel %vm1718_vm3, %v2430_v4, %v3051_v23  ;;  %2441 = vrcp.f32 %v1639_v1  ;;  %v3107_v10 = vadd.f32 %v2939_v21, %v1488_v43  ;;  %v2221_v12 = vpop.f32.mrb[58].mxu1 }
 0x250   : > { %v2434_v49 = vpop.eup %2433  ;;  %1767 = vst [vmem:[%s2972_s9 + $0x80] sm:$0xff] %v1735_v7  ;;  %v1738_v14 = vsel %vm1718_vm3, %v2432_v31, %v3055_v26  ;;  %v1994_v16 = vmul.f32 -1.442695, %v3100_v6  ;;  %v3115_v18 = vadd.f32 %v2221_v12, %v2939_v21  ;;  %v1491_v19 = vpop.f32.mrb[59].mxu1 }
 0x251   : > { %v2436_v15 = vpop.eup %2435  ;;  %1770 = vst [vmem:[%s2972_s9 + $0x98] sm:$0xff] %v1738_v14  ;;  %v1736_v23 = vsel %vm1718_vm3, %v2434_v49, %v3058_v27  ;;  %v1992_v28 = vmul.f32 -1.442695, %v3107_v10  ;;  %v3123_v22 = vadd.f32 %v2939_v21, %v1491_v19 }
 0x252   : > { %v2438_v25 = vpop.eup %2437  ;;  %1768 = vst [vmem:[%s2972_s9 + $0x88] sm:$0xff] %v1736_v23  ;;  %v1637_v26 = vadd.f32 1.0, %v2436_v15  ;;  %2443 = vpow2.f32 %v1994_v16  ;;  %v1995_v33 = vmul.f32 -1.442695, %v3115_v18 }
 0x253   : > { %v2440_v29 = vpop.eup %2439  ;;  %v1640_v32 = vadd.f32 1.0, %v2438_v25  ;;  %2445 = vpow2.f32 %v1992_v28  ;;  %v1993_v2 = vmul.f32 -1.442695, %v3123_v22 }
 0x254   : > { %2447 = vrcp.f32 %v1637_v26  ;;  %v1638_v34 = vadd.f32 1.0, %v2440_v29 }
 0x255   : > { %2449 = vrcp.f32 %v1640_v32 }
 0x256   : > { %2451 = vrcp.f32 %v1638_v34 }
 0x257   : > { %2453 = vpow2.f32 %v1995_v33 }
 0x258   : > { %2455 = vpow2.f32 %v1993_v2 }
 0x259   : > { %v2442_v27 = vpop.eup %2441 }
 0x25a   : > { %v1741_v8 = vsel %vm1718_vm3, %v2442_v27, %v3072_v20 }
 0x25b   : > { %1773 = vst [vmem:[%s2972_s9 + $0xb0] sm:$0xff] %v1741_v8 }
 0x25c   : > { %v2444_v35 = vpop.eup %2443 }
 0x25d   : > { %v2446_v11 = vpop.eup %2445  ;;  %v1643_v9 = vadd.f32 1.0, %v2444_v35  ;;  %v2224_v13 = vpop.f32.mrb[60].mxu1 }
 0x25e   : > { %v2448_v37 = vpop.eup %2447  ;;  %v1641_v38 = vadd.f32 1.0, %v2446_v11  ;;  %v1513_v39 = vadd.f32 %v2224_v13, %v2939_v21  ;;  %v1504_v17 = vpop.f32.mrb[61].mxu1 }
 0x25f   : > { %v2450_v40 = vpop.eup %2449  ;;  %v1739_v41 = vsel %vm1718_vm3, %v2448_v37, %v3079_v47  ;;  %2457 = vrcp.f32 %v1643_v9  ;;  %v1505_v20 = vadd.f32 %v2939_v21, %v1504_v17  ;;  %v2225_v42 = vpop.f32.mrb[62].mxu1 }
 0x260   : > { %v2452_v44 = vpop.eup %2451  ;;  %1771 = vst [vmem:[%s2972_s9 + $0xa0] sm:$0xff] %v1739_v41  ;;  %v1742_v46 = vsel %vm1718_vm3, %v2450_v40, %v3087_v59  ;;  %2459 = vrcp.f32 %v1641_v38  ;;  %v1998_v48 = vmul.f32 -1.442695, %v1513_v39  ;;  %v1516_v54 = vadd.f32 %v2225_v42, %v2939_v21  ;;  %v1507_v45 = vpop.f32.mrb[63].mxu1 }
 0x261   : > { %v2454_v50 = vpop.eup %2453  ;;  %1774 = vst [vmem:[%s2972_s9 + $0xb8] sm:$0xff] %v1742_v46  ;;  %v1740_v47 = vsel %vm1718_vm3, %v2452_v44, %v3091_v55  ;;  %v1996_v53 = vmul.f32 -1.442695, %v1505_v20  ;;  %v1508_v63 = vadd.f32 %v2939_v21, %v1507_v45 }
 0x262   : > { %v2456_v51 = vpop.eup %2455  ;;  %1772 = vst [vmem:[%s2972_s9 + $0xa8] sm:$0xff] %v1740_v47  ;;  %v1644_v56 = vadd.f32 1.0, %v2454_v50  ;;  %2461 = vpow2.f32 %v1998_v48  ;;  %v1999_v59 = vmul.f32 -1.442695, %v1516_v54 }
 0x263   : > { %v1642_v5 = vadd.f32 1.0, %v2456_v51  ;;  %2463 = vpow2.f32 %v1996_v53  ;;  %v1997_v57 = vmul.f32 -1.442695, %v1508_v63 }
 0x264   : > { %2465 = vrcp.f32 %v1644_v56 }
 0x265   : > { %2467 = vrcp.f32 %v1642_v5 }
 0x266   : > { %2469 = vpow2.f32 %v1999_v59 }
 0x267   : > { %2471 = vpow2.f32 %v1997_v57 }
 0x269   : > { %v2458_v24 = vpop.eup %2457 }
 0x26a   : > { %v2460_v55 = vpop.eup %2459  ;;  %v1745_v21 = vsel %vm1718_vm3, %v2458_v24, %v3100_v6 }
 0x26b   : > { %1777 = vst [vmem:[%s2972_s9 + $0xd0] sm:$0xff] %v1745_v21  ;;  %v1743_v30 = vsel %vm1718_vm3, %v2460_v55, %v3107_v10 }
 0x26c   : > { %v2462_v60 = vpop.eup %2461  ;;  %1775 = vst [vmem:[%s2972_s9 + $0xc0] sm:$0xff] %v1743_v30 }
 0x26d   : > { %v2464_v61 = vpop.eup %2463  ;;  %v1647_v62 = vadd.f32 1.0, %v2462_v60 }
 0x26e   : > { %v2466_v0 = vpop.eup %2465  ;;  %v1645_v52 = vadd.f32 1.0, %v2464_v61 }
 0x26f   : > { %v2468_v1 = vpop.eup %2467  ;;  %v1746_v3 = vsel %vm1718_vm3, %v2466_v0, %v3115_v18  ;;  %2473 = vrcp.f32 %v1647_v62 }
 0x270   : > { %v2470_v4 = vpop.eup %2469  ;;  %1778 = vst [vmem:[%s2972_s9 + $0xd8] sm:$0xff] %v1746_v3  ;;  %v1744_v58 = vsel %vm1718_vm3, %v2468_v1, %v3123_v22  ;;  %2475 = vrcp.f32 %v1645_v52 }
 0x271   : > { %v2472_v6 = vpop.eup %2471  ;;  %1776 = vst [vmem:[%s2972_s9 + $0xc8] sm:$0xff] %v1744_v58  ;;  %v1648_v43 = vadd.f32 1.0, %v2470_v4 }
 0x272   : > { %v1646_v31 = vadd.f32 1.0, %v2472_v6 }
 0x273   : > { %2477 = vrcp.f32 %v1648_v43 }
 0x274   : > { %2479 = vrcp.f32 %v1646_v31 }
 0x279   : > { %v2474_v7 = vpop.eup %2473 }
 0x27a   : > { %v2476_v10 = vpop.eup %2475  ;;  %v1749_v12 = vsel %vm1718_vm3, %v2474_v7, %v1513_v39 }
 0x27b   : > { %1781 = vst [vmem:[%s2972_s9 + $0xf0] sm:$0xff] %v1749_v12  ;;  %v1747_v49 = vsel %vm1718_vm3, %v2476_v10, %v1505_v20 }
 0x27c   : > { %1779 = vst [vmem:[%s2972_s9 + $0xe0] sm:$0xff] %v1747_v49 }
 0x27d   : > { %v2478_v14 = vpop.eup %2477 }
 0x27e   : > { %v2480_v16 = vpop.eup %2479  ;;  %v1750_v18 = vsel %vm1718_vm3, %v2478_v14, %v1516_v54 }
 0x27f   : > { %1782 = vst [vmem:[%s2972_s9 + $0xf8] sm:$0xff] %v1750_v18  ;;  %v1748_v19 = vsel %vm1718_vm3, %v2480_v16, %v1508_v63 }
 0x280   : > { %1780 = vst [vmem:[%s2972_s9 + $0xe8] sm:$0xff] %v1748_v19 }
 0x281   : > { %2494 = shalt.err (!%p2491_p3)
}
 0x282   : > { %s2495_s22 = scalar_lea.hbm %s3175_s19, 4096  ;;  %s2499_s8 = scalar_lea.hbm %s3235_s7, 8192 }
 0x283   : > { %p2496_p4 = scmp.ne.s32.totalorder %s3175_s19, %s2495_s22  ;;  %p2500_p9 = scmp.lt.u32.totalorder %s3175_s19, %s3235_s7 }
 0x284   : > { %p2501_p10 = scmp.lt.u32.totalorder %s2499_s8, %s2495_s22  ;;  %p2503_p12 = scmp.lt.u32.totalorder %s2495_s22, %s3175_s19 }
 0x285   : > { %p2497_p7 = pnand %p2496_p4, %p2627_p5 }
 0x286   : > { %p2502_p11 = por %p2501_p10, %p2500_p9 }
 0x287   : > { %p2498_p8 = pneg %p2497_p7 }
 0x288   : > { %p2504_p13 = por %p2503_p12, %p2502_p11 }
 0x28a   : > { %p2505_p0 = pnand %p2504_p13, %p2498_p8 }
 0x28c   : > { %2508 = shalt.err (!%p2505_p0)
}
 0x28d   : > { %s2547_s16 = smov 128   ;;  %s2548_s17 = smov 8  }
 0x28e   : > { %2227 = dma.vmem_to_hbm [thread:$0]  (%p2627_p5), %s3177_s15, 4096, %s3175_s19, %s3187_s28, %s2547_s16, %s2547_s16, %s2548_s17  }
 0x28f PF: > { %p2233_p1 = scmp.ge.s32.totalorder %s2543_s27, 2  ;;  %s1812_s14 = sand.u32 1, %s2531_s24  }
 0x290   : > { %s1813_s20 = scalar_lea.sflag [#allocation3], %s1812_s14 }
 0x291   : > { %p2230_p2 = pnand %p2233_p1, %p2631_p6 }
 0x293   : > { %2526 = dma.done.wait (!%p2230_p2), %s1813_s20, 4096  }
 0x294   : > { %2528 = vsyncadd (!%p2230_p2), %s1813_s20, 4294963200  ;;  %p17_p3 = scmp.ge.s32.totalorder %s2614_s30, 4   ;;  %s3238_s24 = smov %s2535_s25 }
 0x295   : > { %s3239_s25 = smov %s2539_s26  ;;  %s3240_s26 = smov %s2625_s10 }
 0x296   : > { %s3241_s27 = smov %s2614_s30  ;;  %19 = sbr.rel (!%p17_p3) target bundleno = 3 (0x3), region = 83 }
 0x29d   :  { %1818 = vsyncpa [#allocation3], 1 }
 0x29e   :  { %1820 = vsyncpa [#allocation3 + $0x1], 1 }

</bundles_post_ra>
